<compile_context>
chip_gen: v6e
topology: v6e:2x2x1
jax: 0.10.0
libtpu: 0.0.40
codegen_flags: <defaults>
</compile_context>

<pallas_src>
import math

import jax
import jax.numpy as jnp
import numpy as np
from jax import lax
from jax.experimental import pallas as pl
from jax.experimental.pallas import tpu as pltpu

_LN_EPS = 1e-5
_MASK_VALUE = -1e30                     # large finite negative (NaN-safe)

# `None` is the long-standing spelling of a squeezed size-1 block dim; use the
# explicit pl.Squeezed() where this JAX build provides it.
_SQUEEZED = pl.Squeezed() if hasattr(pl, "Squeezed") else None


def _vmem_limit_bytes():
    """3/4 of physical per-core VMEM (capped at 100 MiB), 48 MiB fallback.

    Leaves headroom for Mosaic internal scratch / semaphores on v7x (64 MiB
    physical) while letting v5e/v6e (128 MiB) use larger row tiles."""
    try:
        cap = pltpu.get_tpu_info().vmem_capacity_bytes
    except Exception:
        cap = 64 * 1024 * 1024
    return min((int(cap) * 3) // 4, 100 * 1024 * 1024)


def _pick_tile(t, cap=256):
    """Largest row tile (multiple of 8, <= cap) dividing t, else t itself."""
    for c in (512, 256, 128, 64, 32, 16, 8):
        if c <= cap and t % c == 0:
            return c
    return t


def _pick_ff_tile(ffn, cap=1024):
    """Hidden-dim (4C) slab width: a multiple of 128 dividing ffn, else ffn."""
    for c in (1024, 512, 256, 128):
        if c <= cap and ffn % c == 0:
            return c
    return ffn


def _const_spec(shape, single_buffer=True):
    """BlockSpec for a grid-invariant (weight / bias) operand: constant
    index_map (DMA'd once) and, where supported, single-buffered."""
    nd = len(shape)
    idx = lambda *_: (0,) * nd
    if single_buffer and hasattr(pl, "Buffered"):
        return pl.BlockSpec(shape, idx, pipeline_mode=pl.Buffered(1))
    return pl.BlockSpec(shape, idx)


# --------------------- kernel 1: LN1 + fused QKV projection -----------------
def _make_qkv_kernel(n_head, hd):
    C = n_head * hd

    def kernel(x_ref, ln_w_ref, ln_b_ref, w_ref, b_ref, q_ref, k_ref, v_ref):
        x = x_ref[...]                                         # (TM, C) f32
        mu = jnp.mean(x, axis=-1, keepdims=True)
        var = jnp.mean(jnp.square(x - mu), axis=-1, keepdims=True)
        h = (x - mu) * lax.rsqrt(var + _LN_EPS) * ln_w_ref[0] + ln_b_ref[0]
        hb = h.astype(jnp.bfloat16)
        # one full-width MXU dot: (TM, C) x (C, 3C); bias added in f32.
        qkv = jnp.dot(hb, w_ref[...], preferred_element_type=jnp.float32) + b_ref[...]
        for hi in range(n_head):                               # static slice-stores
            q_ref[hi] = qkv[:, hi * hd:(hi + 1) * hd].astype(q_ref.dtype)
            k_ref[hi] = qkv[:, C + hi * hd:C + (hi + 1) * hd].astype(k_ref.dtype)
            v_ref[hi] = qkv[:, 2 * C + hi * hd:2 * C + (hi + 1) * hd].astype(v_ref.dtype)
    return kernel


# --------------------- kernel 2: causal flash attention ---------------------
def _make_flash_kernel(tq):
    def kernel(q_ref, k_ref, v_ref, o_ref):
        qi = pl.program_id(2)
        q = q_ref[...]                       # (TQ, hd) bf16; 1/sqrt(hd) folded in
        hd = q.shape[-1]

        def kv_step(ki, carry):
            m, l, acc = carry
            start = pl.multiple_of(ki * tq, tq)
            k = k_ref[pl.ds(start, tq), :]
            v = v_ref[pl.ds(start, tq), :]
            s = lax.dot_general(q, k, (((1,), (1,)), ((), ())),
                                preferred_element_type=jnp.float32)
            m_new = jnp.maximum(m, s.max(axis=-1, keepdims=True))
            alpha = jnp.exp(m - m_new)
            p = jnp.exp(s - m_new)
            l = alpha * l + p.sum(axis=-1, keepdims=True)
            acc = alpha * acc + jnp.dot(p.astype(jnp.bfloat16), v,
                                        preferred_element_type=jnp.float32)
            return m_new, l, acc

        m0 = jnp.full((tq, 1), -jnp.inf, jnp.float32)
        l0 = jnp.zeros((tq, 1), jnp.float32)
        a0 = jnp.zeros((tq, hd), jnp.float32)

        # strictly-lower KV blocks: fully unmasked, no iota / compare / where.
        m, l, acc = lax.fori_loop(0, qi, kv_step, (m0, l0, a0))

        # diagonal block: apply the causal mask locally (TQ == TK).
        start = pl.multiple_of(qi * tq, tq)
        k = k_ref[pl.ds(start, tq), :]
        v = v_ref[pl.ds(start, tq), :]
        s = lax.dot_general(q, k, (((1,), (1,)), ((), ())),
                            preferred_element_type=jnp.float32)
        row = lax.broadcasted_iota(jnp.int32, (tq, tq), 0)
        col = lax.broadcasted_iota(jnp.int32, (tq, tq), 1)
        s = jnp.where(col <= row, s, _MASK_VALUE)
        m_new = jnp.maximum(m, s.max(axis=-1, keepdims=True))
        alpha = jnp.exp(m - m_new)
        p = jnp.exp(s - m_new)
        l = alpha * l + p.sum(axis=-1, keepdims=True)
        acc = alpha * acc + jnp.dot(p.astype(jnp.bfloat16), v,
                                    preferred_element_type=jnp.float32)

        inv_l = pl.reciprocal(l, approx=True)                  # EUP, ~free
        o_ref[...] = (acc * inv_l).astype(o_ref.dtype)
    return kernel


# ---- kernel 3: out-proj + residual + LN2 + hidden-tiled MLP + residual -----
def _make_post_kernel(n_head):
    inv_sqrt2 = 1.0 / math.sqrt(2.0)

    def kernel(x_ref, y_ref, wpr_ref, bpr_ref, ln2_w_ref, ln2_b_ref,
               wfc_ref, bfc_ref, wmp_ref, bmp_ref, out_ref,
               x1_scr, h2_scr, acc_scr):
        f = pl.program_id(2)

        @pl.when(f == 0)
        def _prologue():
            x = x_ref[...]                                     # (TM, C) f32
            # single lane-concat relayout to a channel-contiguous (TM, C) slab,
            # then ONE full-K projection dot instead of n_head K=hd dots.
            y_flat = jnp.concatenate([y_ref[hi] for hi in range(n_head)], axis=-1)
            proj = jnp.dot(y_flat, wpr_ref[...], preferred_element_type=jnp.float32)
            x1 = x + proj + bpr_ref[...]                       # residual 1
            x1_scr[...] = x1
            mu = jnp.mean(x1, axis=-1, keepdims=True)
            var = jnp.mean(jnp.square(x1 - mu), axis=-1, keepdims=True)
            h2 = (x1 - mu) * lax.rsqrt(var + _LN_EPS) * ln2_w_ref[0] + ln2_b_ref[0]
            h2_scr[...] = h2.astype(h2_scr.dtype)
            acc_scr[...] = jnp.zeros_like(acc_scr)

        # one (C, TF) / (TF, C) slab of the MLP per grid step (hidden-dim tiled)
        fc = jnp.dot(h2_scr[...], wfc_ref[...],
                     preferred_element_type=jnp.float32) + bfc_ref[...]
        g = 0.5 * fc * (1.0 + lax.erf(fc * inv_sqrt2))         # exact GELU, f32
        acc_scr[...] += jnp.dot(g.astype(jnp.bfloat16), wmp_ref[...],
                                preferred_element_type=jnp.float32)

        @pl.when(f == pl.num_programs(2) - 1)
        def _epilogue():
            out_ref[...] = x1_scr[...] + acc_scr[...] + bmp_ref[...]   # residual 2
    return kernel


# ------------------------------- wrapper ------------------------------------
def block_forward(x, params, n_head, *, block_t=None, attn_t=None, ff_t=None,
                  max_block_t=256, single_buffer_weights=True):
    """x: (B, T, C) float32.  params: 12 f32 arrays as produced by _init_params."""
    (ln1_w, ln1_b, w_qkv, b_qkv, w_pr, b_pr,
     ln2_w, ln2_b, w_fc, b_fc, w_mp, b_mp) = params
    B, T, C = x.shape
    assert C % n_head == 0
    hd = C // n_head
    ffn = 4 * C

    if block_t is None:
        block_t = _pick_tile(T, cap=max_block_t)
    if attn_t is None:
        attn_t = _pick_tile(T, cap=max_block_t)   # decoupled from row tile
    if ff_t is None:
        ff_t = _pick_ff_tile(ffn)
    assert T % block_t == 0 and T % attn_t == 0 and ffn % ff_t == 0
    nt = T // block_t
    nq = T // attn_t
    nf = ffn // ff_t
    sq = _SQUEEZED
    vmem_limit = _vmem_limit_bytes()

    # --- one-time weight prep (wrapper side) ---
    scale = 1.0 / math.sqrt(hd)
    w_qkv_s = w_qkv.at[:, :C].multiply(scale)     # fold attention scale into Wq
    b_qkv_s = b_qkv.at[:, :C].multiply(scale)     # ... and bq
    wqkv_bf = w_qkv_s.astype(jnp.bfloat16)
    wpr_bf = w_pr.astype(jnp.bfloat16)
    wfc_bf = w_fc.astype(jnp.bfloat16)
    wmp_bf = w_mp.astype(jnp.bfloat16)

    def cs(shape):
        return _const_spec(shape, single_buffer_weights)

    # -------- kernel 1: LN1 + fused QKV projection --------
    qkv_shape = jax.ShapeDtypeStruct((B, n_head, T, hd), jnp.bfloat16)
    q, k, v = pl.pallas_call(
        _make_qkv_kernel(n_head, hd),
        out_shape=(qkv_shape, qkv_shape, qkv_shape),
        grid=(B, nt),
        in_specs=[
            pl.BlockSpec((sq, block_t, C), lambda b, i: (b, i, 0)),
            cs((1, C)), cs((1, C)),
            cs((C, 3 * C)), cs((1, 3 * C)),
        ],
        out_specs=tuple(
            pl.BlockSpec((sq, n_head, block_t, hd), lambda b, i: (b, 0, i, 0))
            for _ in range(3)),
        compiler_params=pltpu.CompilerParams(
            dimension_semantics=("parallel", "parallel"),
            vmem_limit_bytes=vmem_limit),
    )(x, ln1_w, ln1_b, wqkv_bf, b_qkv_s)

    # -------- kernel 2: causal flash attention (KV loop inside kernel) --------
    q_spec = pl.BlockSpec((sq, sq, attn_t, hd), lambda b, h, qi: (b, h, qi, 0))
    kv_spec = pl.BlockSpec((sq, sq, T, hd), lambda b, h, qi: (b, h, 0, 0))
    y = pl.pallas_call(
        _make_flash_kernel(attn_t),
        out_shape=jax.ShapeDtypeStruct((B, n_head, T, hd), jnp.bfloat16),
        grid=(B, n_head, nq),
        in_specs=[q_spec, kv_spec, kv_spec],
        out_specs=q_spec,
        compiler_params=pltpu.CompilerParams(
            dimension_semantics=("parallel", "parallel", "parallel"),
            vmem_limit_bytes=vmem_limit),
    )(q, k, v)

    # -------- kernel 3: out-proj + residual + LN2 + MLP (4C-tiled) + residual --------
    out = pl.pallas_call(
        _make_post_kernel(n_head),
        out_shape=jax.ShapeDtypeStruct((B, T, C), jnp.float32),
        grid=(B, nt, nf),
        in_specs=[
            pl.BlockSpec((sq, block_t, C), lambda b, i, f: (b, i, 0)),
            pl.BlockSpec((sq, n_head, block_t, hd), lambda b, i, f: (b, 0, i, 0)),
            cs((C, C)), cs((1, C)), cs((1, C)), cs((1, C)),
            pl.BlockSpec((C, ff_t), lambda b, i, f: (0, f)),      # wfc slab (streamed)
            pl.BlockSpec((1, ff_t), lambda b, i, f: (0, f)),      # bfc slab
            pl.BlockSpec((ff_t, C), lambda b, i, f: (f, 0)),      # wmp slab (streamed)
            cs((1, C)),
        ],
        out_specs=pl.BlockSpec((sq, block_t, C), lambda b, i, f: (b, i, 0)),
        scratch_shapes=[
            pltpu.VMEM((block_t, C), jnp.float32),     # x1 (residual-1 result)
            pltpu.VMEM((block_t, C), jnp.bfloat16),    # LN2 output (MXU operand)
            pltpu.VMEM((block_t, C), jnp.float32),     # MLP accumulator
        ],
        compiler_params=pltpu.CompilerParams(
            dimension_semantics=("parallel", "parallel", "arbitrary"),
            vmem_limit_bytes=vmem_limit),
    )(x, y, wpr_bf, b_pr, ln2_w, ln2_b, wfc_bf, b_fc, wmp_bf, b_mp)
    return out


# ------------------------- synthetic params & reference ---------------------
def _init_params(key, C):
    """Deterministic synthetic parameters (config.bias=True); Linear weights are
    stored pre-transposed as (in_features, out_features)."""
    ks = jax.random.split(key, 6)
    s = 0.1
    ln1_w = jnp.ones((1, C), jnp.float32)
    ln1_b = jnp.zeros((1, C), jnp.float32)
    w_qkv = s * jax.random.normal(ks[0], (C, 3 * C), jnp.float32)
    b_qkv = s * jax.random.normal(ks[1], (1, 3 * C), jnp.float32)
    w_pr = s * jax.random.normal(ks[2], (C, C), jnp.float32)
    b_pr = jnp.zeros((1, C), jnp.float32)
    ln2_w = jnp.ones((1, C), jnp.float32)
    ln2_b = jnp.zeros((1, C), jnp.float32)
    w_fc = s * jax.random.normal(ks[3], (C, 4 * C), jnp.float32)
    b_fc = s * jax.random.normal(ks[4], (1, 4 * C), jnp.float32)
    w_mp = s * jax.random.normal(ks[5], (4 * C, C), jnp.float32)
    b_mp = jnp.zeros((1, C), jnp.float32)
    return (ln1_w, ln1_b, w_qkv, b_qkv, w_pr, b_pr,
            ln2_w, ln2_b, w_fc, b_fc, w_mp, b_mp)


def _ref_block(x, params, n_head):
    """Pure-JAX f32 reference matching the PyTorch Block forward (eval mode)."""
    (ln1w, ln1b, wqkv, bqkv, wpr, bpr, ln2w, ln2b, wfc, bfc, wmp, bmp) = params
    B, T, C = x.shape
    hd = C // n_head

    def ln(v, w, b):
        mu = v.mean(-1, keepdims=True)
        var = ((v - mu) ** 2).mean(-1, keepdims=True)
        return (v - mu) / jnp.sqrt(var + 1e-5) * w[0] + b[0]

    h = ln(x, ln1w, ln1b)
    qkv = h @ wqkv + bqkv[0]
    q, k, v = jnp.split(qkv, 3, axis=-1)
    q = q.reshape(B, T, n_head, hd).transpose(0, 2, 1, 3)
    k = k.reshape(B, T, n_head, hd).transpose(0, 2, 1, 3)
    v = v.reshape(B, T, n_head, hd).transpose(0, 2, 1, 3)
    att = jnp.einsum("bhtd,bhsd->bhts", q, k) / math.sqrt(hd)
    mask = jnp.tril(jnp.ones((T, T), bool))
    att = jnp.where(mask[None, None], att, -jnp.inf)
    att = jax.nn.softmax(att, axis=-1)
    y = jnp.einsum("bhts,bhsd->bhtd", att, v).transpose(0, 2, 1, 3).reshape(B, T, C)
    x1 = x + (y @ wpr + bpr[0])

    h2 = ln(x1, ln2w, ln2b)
    f = h2 @ wfc + bfc[0]
    f = 0.5 * f * (1.0 + lax.erf(f / math.sqrt(2.0)))
    return x1 + (f @ wmp + bmp[0])


if __name__ == "__main__":
    # Small but multi-tile shapes: block_t=attn_t=8 with T=32 exercises the
    # in-kernel causal KV loop and diagonal masking; ff_t=128 with 4C=256
    # exercises the hidden-dim-tiled MLP accumulator (nf=2).
    B, T, C, n_head = 2, 32, 64, 4
    key = jax.random.PRNGKey(0)
    kx, kp = jax.random.split(key)
    x = jax.random.normal(kx, (B, T, C), jnp.float32)
    params = _init_params(kp, C)

    def run(single_buffer):
        return jax.block_until_ready(block_forward(
            x, params, n_head, block_t=8, attn_t=8, ff_t=128,
            single_buffer_weights=single_buffer))

    try:
        out = run(True)
    except Exception:
        # Graceful fallback if this JAX build rejects single-buffered weight
        # specs (pipeline_mode=pl.Buffered(1)); everything else is unchanged.
        out = run(False)

    ref = _ref_block(x, params, n_head)
    # bf16 matmul operands (f32 accumulation) => relaxed tolerance vs f32 reference.
    np.testing.assert_allclose(np.asarray(out), np.asarray(ref), rtol=3e-2, atol=3e-2)

    print("KERNEL_OK")
</pallas_src>

<mosaic_0001>
module attributes {stable_mosaic.version = 11 : i64} {
  func.func @kernel(%arg0: i32, %arg1: i32, %arg2: memref<1x8x64xf32, #tpu.memory_space<vmem>>, %arg3: memref<1x64xf32, #tpu.memory_space<vmem>>, %arg4: memref<1x64xf32, #tpu.memory_space<vmem>>, %arg5: memref<64x192xbf16, #tpu.memory_space<vmem>>, %arg6: memref<1x192xf32, #tpu.memory_space<vmem>>, %arg7: memref<1x4x8x16xbf16, #tpu.memory_space<vmem>>, %arg8: memref<1x4x8x16xbf16, #tpu.memory_space<vmem>>, %arg9: memref<1x4x8x16xbf16, #tpu.memory_space<vmem>>) attributes {dimension_semantics = [#tpu.dimension_semantics<parallel>, #tpu.dimension_semantics<parallel>], iteration_bounds = array<i64: 2, 4>, scalar_prefetch = 0 : i64, scratch_operands = 0 : i64, tpu.core_type = #tpu.core_type<tc>, window_params = [{transform_indices = @transform_0, window_bounds = array<i64: 1, 8, 64>}, {pipeline_mode = #tpu.pipeline_mode<synchronous>, transform_indices = @transform_1, window_bounds = array<i64: 1, 64>}, {pipeline_mode = #tpu.pipeline_mode<synchronous>, transform_indices = @transform_2, window_bounds = array<i64: 1, 64>}, {pipeline_mode = #tpu.pipeline_mode<synchronous>, transform_indices = @transform_3, window_bounds = array<i64: 64, 192>}, {pipeline_mode = #tpu.pipeline_mode<synchronous>, transform_indices = @transform_4, window_bounds = array<i64: 1, 192>}, {transform_indices = @transform_5, window_bounds = array<i64: 1, 4, 8, 16>}, {transform_indices = @transform_6, window_bounds = array<i64: 1, 4, 8, 16>}, {transform_indices = @transform_7, window_bounds = array<i64: 1, 4, 8, 16>}]} {
    %c0 = arith.constant 0 : index
    %c0_0 = arith.constant 0 : index
    %c0_1 = arith.constant 0 : index
    %0 = vector.load %arg2[%c0, %c0_0, %c0_1] : memref<1x8x64xf32, #tpu.memory_space<vmem>>, vector<1x8x64xf32>
    %1 = vector.shape_cast %0 : vector<1x8x64xf32> to vector<8x64xf32>
    %cst = arith.constant dense<0.000000e+00> : vector<8xf32>
    %2 = vector.multi_reduction <add>, %1, %cst [1] : vector<8x64xf32> to vector<8xf32>
    %3 = vector.shape_cast %2 : vector<8xf32> to vector<8x1xf32>
    %cst_2 = arith.constant 6.400000e+01 : f32
    %4 = vector.broadcast %cst_2 : f32 to vector<8x1xf32>
    %5 = arith.divf %3, %4 : vector<8x1xf32>
    %6 = vector.broadcast %5 : vector<8x1xf32> to vector<8x64xf32>
    %7 = arith.subf %1, %6 : vector<8x64xf32>
    %8 = arith.mulf %7, %7 : vector<8x64xf32>
    %cst_3 = arith.constant dense<0.000000e+00> : vector<8xf32>
    %9 = vector.multi_reduction <add>, %8, %cst_3 [1] : vector<8x64xf32> to vector<8xf32>
    %10 = vector.shape_cast %9 : vector<8xf32> to vector<8x1xf32>
    %cst_4 = arith.constant 6.400000e+01 : f32
    %11 = vector.broadcast %cst_4 : f32 to vector<8x1xf32>
    %12 = arith.divf %10, %11 : vector<8x1xf32>
    %13 = vector.broadcast %5 : vector<8x1xf32> to vector<8x64xf32>
    %14 = arith.subf %1, %13 : vector<8x64xf32>
    %cst_5 = arith.constant 9.99999974E-6 : f32
    %15 = vector.broadcast %cst_5 : f32 to vector<8x1xf32>
    %16 = arith.addf %12, %15 : vector<8x1xf32>
    %17 = math.rsqrt %16 : vector<8x1xf32>
    %18 = vector.broadcast %17 : vector<8x1xf32> to vector<8x64xf32>
    %19 = arith.mulf %14, %18 : vector<8x64xf32>
    %c0_6 = arith.constant 0 : index
    %c0_7 = arith.constant 0 : index
    %20 = vector.load %arg3[%c0_6, %c0_7] : memref<1x64xf32, #tpu.memory_space<vmem>>, vector<1x64xf32>
    %21 = vector.shape_cast %20 : vector<1x64xf32> to vector<64xf32>
    %22 = vector.shape_cast %21 : vector<64xf32> to vector<1x64xf32>
    %23 = vector.broadcast %22 : vector<1x64xf32> to vector<8x64xf32>
    %24 = arith.mulf %19, %23 : vector<8x64xf32>
    %c0_8 = arith.constant 0 : index
    %c0_9 = arith.constant 0 : index
    %25 = vector.load %arg4[%c0_8, %c0_9] : memref<1x64xf32, #tpu.memory_space<vmem>>, vector<1x64xf32>
    %26 = vector.shape_cast %25 : vector<1x64xf32> to vector<64xf32>
    %27 = vector.shape_cast %26 : vector<64xf32> to vector<1x64xf32>
    %28 = vector.broadcast %27 : vector<1x64xf32> to vector<8x64xf32>
    %29 = arith.addf %24, %28 : vector<8x64xf32>
    %30 = arith.truncf %29 : vector<8x64xf32> to vector<8x64xbf16>
    %c0_10 = arith.constant 0 : index
    %c0_11 = arith.constant 0 : index
    %31 = vector.load %arg5[%c0_10, %c0_11] : memref<64x192xbf16, #tpu.memory_space<vmem>>, vector<64x192xbf16>
    %cst_12 = arith.constant dense<0.000000e+00> : vector<8x192xf32>
    %32 = tpu.matmul %30, %31, %cst_12 {dimension_numbers = #tpu.dot_dimension_numbers<[1], [0], [0], [1], [0, 0, 1, 1], [], []>} : vector<8x64xbf16>, vector<64x192xbf16>, vector<8x192xf32> -> vector<8x192xf32>
    %c0_13 = arith.constant 0 : index
    %c0_14 = arith.constant 0 : index
    %33 = vector.load %arg6[%c0_13, %c0_14] : memref<1x192xf32, #tpu.memory_space<vmem>>, vector<1x192xf32>
    %34 = vector.broadcast %33 : vector<1x192xf32> to vector<8x192xf32>
    %35 = arith.addf %32, %34 : vector<8x192xf32>
    %36 = vector.extract_strided_slice %35 {offsets = [0, 0], sizes = [8, 16], strides = [1, 1]} : vector<8x192xf32> to vector<8x16xf32>
    %37 = arith.truncf %36 : vector<8x16xf32> to vector<8x16xbf16>
    %c0_15 = arith.constant 0 : index
    %c0_16 = arith.constant 0 : index
    %c0_17 = arith.constant 0 : index
    %c0_18 = arith.constant 0 : index
    %38 = vector.load %arg7[%c0_15, %c0_16, %c0_17, %c0_18] : memref<1x4x8x16xbf16, #tpu.memory_space<vmem>>, vector<1x1x8x16xbf16>
    %39 = vector.shape_cast %38 : vector<1x1x8x16xbf16> to vector<8x16xbf16>
    %40 = vector.shape_cast %37 : vector<8x16xbf16> to vector<1x1x8x16xbf16>
    tpu.vector_store %arg7[%c0_15, %c0_16, %c0_17, %c0_18], %40 {strides = array<i32>} : memref<1x4x8x16xbf16, #tpu.memory_space<vmem>>, vector<1x1x8x16xbf16>,
    %41 = vector.extract_strided_slice %35 {offsets = [0, 64], sizes = [8, 16], strides = [1, 1]} : vector<8x192xf32> to vector<8x16xf32>
    %42 = arith.truncf %41 : vector<8x16xf32> to vector<8x16xbf16>
    %c0_19 = arith.constant 0 : index
    %c0_20 = arith.constant 0 : index
    %c0_21 = arith.constant 0 : index
    %c0_22 = arith.constant 0 : index
    %43 = vector.load %arg8[%c0_19, %c0_20, %c0_21, %c0_22] : memref<1x4x8x16xbf16, #tpu.memory_space<vmem>>, vector<1x1x8x16xbf16>
    %44 = vector.shape_cast %43 : vector<1x1x8x16xbf16> to vector<8x16xbf16>
    %45 = vector.shape_cast %42 : vector<8x16xbf16> to vector<1x1x8x16xbf16>
    tpu.vector_store %arg8[%c0_19, %c0_20, %c0_21, %c0_22], %45 {strides = array<i32>} : memref<1x4x8x16xbf16, #tpu.memory_space<vmem>>, vector<1x1x8x16xbf16>,
    %46 = vector.extract_strided_slice %35 {offsets = [0, 128], sizes = [8, 16], strides = [1, 1]} : vector<8x192xf32> to vector<8x16xf32>
    %47 = arith.truncf %46 : vector<8x16xf32> to vector<8x16xbf16>
    %c0_23 = arith.constant 0 : index
    %c0_24 = arith.constant 0 : index
    %c0_25 = arith.constant 0 : index
    %c0_26 = arith.constant 0 : index
    %48 = vector.load %arg9[%c0_23, %c0_24, %c0_25, %c0_26] : memref<1x4x8x16xbf16, #tpu.memory_space<vmem>>, vector<1x1x8x16xbf16>
    %49 = vector.shape_cast %48 : vector<1x1x8x16xbf16> to vector<8x16xbf16>
    %50 = vector.shape_cast %47 : vector<8x16xbf16> to vector<1x1x8x16xbf16>
    tpu.vector_store %arg9[%c0_23, %c0_24, %c0_25, %c0_26], %50 {strides = array<i32>} : memref<1x4x8x16xbf16, #tpu.memory_space<vmem>>, vector<1x1x8x16xbf16>,
    %51 = vector.extract_strided_slice %35 {offsets = [0, 16], sizes = [8, 16], strides = [1, 1]} : vector<8x192xf32> to vector<8x16xf32>
    %52 = arith.truncf %51 : vector<8x16xf32> to vector<8x16xbf16>
    %c0_27 = arith.constant 0 : index
    %c1 = arith.constant 1 : index
    %c0_28 = arith.constant 0 : index
    %c0_29 = arith.constant 0 : index
    %53 = vector.load %arg7[%c0_27, %c1, %c0_28, %c0_29] : memref<1x4x8x16xbf16, #tpu.memory_space<vmem>>, vector<1x1x8x16xbf16>
    %54 = vector.shape_cast %53 : vector<1x1x8x16xbf16> to vector<8x16xbf16>
    %55 = vector.shape_cast %52 : vector<8x16xbf16> to vector<1x1x8x16xbf16>
    tpu.vector_store %arg7[%c0_27, %c1, %c0_28, %c0_29], %55 {strides = array<i32>} : memref<1x4x8x16xbf16, #tpu.memory_space<vmem>>, vector<1x1x8x16xbf16>,
    %56 = vector.extract_strided_slice %35 {offsets = [0, 80], sizes = [8, 16], strides = [1, 1]} : vector<8x192xf32> to vector<8x16xf32>
    %57 = arith.truncf %56 : vector<8x16xf32> to vector<8x16xbf16>
    %c0_30 = arith.constant 0 : index
    %c1_31 = arith.constant 1 : index
    %c0_32 = arith.constant 0 : index
    %c0_33 = arith.constant 0 : index
    %58 = vector.load %arg8[%c0_30, %c1_31, %c0_32, %c0_33] : memref<1x4x8x16xbf16, #tpu.memory_space<vmem>>, vector<1x1x8x16xbf16>
    %59 = vector.shape_cast %58 : vector<1x1x8x16xbf16> to vector<8x16xbf16>
    %60 = vector.shape_cast %57 : vector<8x16xbf16> to vector<1x1x8x16xbf16>
    tpu.vector_store %arg8[%c0_30, %c1_31, %c0_32, %c0_33], %60 {strides = array<i32>} : memref<1x4x8x16xbf16, #tpu.memory_space<vmem>>, vector<1x1x8x16xbf16>,
    %61 = vector.extract_strided_slice %35 {offsets = [0, 144], sizes = [8, 16], strides = [1, 1]} : vector<8x192xf32> to vector<8x16xf32>
    %62 = arith.truncf %61 : vector<8x16xf32> to vector<8x16xbf16>
    %c0_34 = arith.constant 0 : index
    %c1_35 = arith.constant 1 : index
    %c0_36 = arith.constant 0 : index
    %c0_37 = arith.constant 0 : index
    %63 = vector.load %arg9[%c0_34, %c1_35, %c0_36, %c0_37] : memref<1x4x8x16xbf16, #tpu.memory_space<vmem>>, vector<1x1x8x16xbf16>
    %64 = vector.shape_cast %63 : vector<1x1x8x16xbf16> to vector<8x16xbf16>
    %65 = vector.shape_cast %62 : vector<8x16xbf16> to vector<1x1x8x16xbf16>
    tpu.vector_store %arg9[%c0_34, %c1_35, %c0_36, %c0_37], %65 {strides = array<i32>} : memref<1x4x8x16xbf16, #tpu.memory_space<vmem>>, vector<1x1x8x16xbf16>,
    %66 = vector.extract_strided_slice %35 {offsets = [0, 32], sizes = [8, 16], strides = [1, 1]} : vector<8x192xf32> to vector<8x16xf32>
    %67 = arith.truncf %66 : vector<8x16xf32> to vector<8x16xbf16>
    %c0_38 = arith.constant 0 : index
    %c2 = arith.constant 2 : index
    %c0_39 = arith.constant 0 : index
    %c0_40 = arith.constant 0 : index
    %68 = vector.load %arg7[%c0_38, %c2, %c0_39, %c0_40] : memref<1x4x8x16xbf16, #tpu.memory_space<vmem>>, vector<1x1x8x16xbf16>
    %69 = vector.shape_cast %68 : vector<1x1x8x16xbf16> to vector<8x16xbf16>
    %70 = vector.shape_cast %67 : vector<8x16xbf16> to vector<1x1x8x16xbf16>
    tpu.vector_store %arg7[%c0_38, %c2, %c0_39, %c0_40], %70 {strides = array<i32>} : memref<1x4x8x16xbf16, #tpu.memory_space<vmem>>, vector<1x1x8x16xbf16>,
    %71 = vector.extract_strided_slice %35 {offsets = [0, 96], sizes = [8, 16], strides = [1, 1]} : vector<8x192xf32> to vector<8x16xf32>
    %72 = arith.truncf %71 : vector<8x16xf32> to vector<8x16xbf16>
    %c0_41 = arith.constant 0 : index
    %c2_42 = arith.constant 2 : index
    %c0_43 = arith.constant 0 : index
    %c0_44 = arith.constant 0 : index
    %73 = vector.load %arg8[%c0_41, %c2_42, %c0_43, %c0_44] : memref<1x4x8x16xbf16, #tpu.memory_space<vmem>>, vector<1x1x8x16xbf16>
    %74 = vector.shape_cast %73 : vector<1x1x8x16xbf16> to vector<8x16xbf16>
    %75 = vector.shape_cast %72 : vector<8x16xbf16> to vector<1x1x8x16xbf16>
    tpu.vector_store %arg8[%c0_41, %c2_42, %c0_43, %c0_44], %75 {strides = array<i32>} : memref<1x4x8x16xbf16, #tpu.memory_space<vmem>>, vector<1x1x8x16xbf16>,
    %76 = vector.extract_strided_slice %35 {offsets = [0, 160], sizes = [8, 16], strides = [1, 1]} : vector<8x192xf32> to vector<8x16xf32>
    %77 = arith.truncf %76 : vector<8x16xf32> to vector<8x16xbf16>
    %c0_45 = arith.constant 0 : index
    %c2_46 = arith.constant 2 : index
    %c0_47 = arith.constant 0 : index
    %c0_48 = arith.constant 0 : index
    %78 = vector.load %arg9[%c0_45, %c2_46, %c0_47, %c0_48] : memref<1x4x8x16xbf16, #tpu.memory_space<vmem>>, vector<1x1x8x16xbf16>
    %79 = vector.shape_cast %78 : vector<1x1x8x16xbf16> to vector<8x16xbf16>
    %80 = vector.shape_cast %77 : vector<8x16xbf16> to vector<1x1x8x16xbf16>
    tpu.vector_store %arg9[%c0_45, %c2_46, %c0_47, %c0_48], %80 {strides = array<i32>} : memref<1x4x8x16xbf16, #tpu.memory_space<vmem>>, vector<1x1x8x16xbf16>,
    %81 = vector.extract_strided_slice %35 {offsets = [0, 48], sizes = [8, 16], strides = [1, 1]} : vector<8x192xf32> to vector<8x16xf32>
    %82 = arith.truncf %81 : vector<8x16xf32> to vector<8x16xbf16>
    %c0_49 = arith.constant 0 : index
    %c3 = arith.constant 3 : index
    %c0_50 = arith.constant 0 : index
    %c0_51 = arith.constant 0 : index
    %83 = vector.load %arg7[%c0_49, %c3, %c0_50, %c0_51] : memref<1x4x8x16xbf16, #tpu.memory_space<vmem>>, vector<1x1x8x16xbf16>
    %84 = vector.shape_cast %83 : vector<1x1x8x16xbf16> to vector<8x16xbf16>
    %85 = vector.shape_cast %82 : vector<8x16xbf16> to vector<1x1x8x16xbf16>
    tpu.vector_store %arg7[%c0_49, %c3, %c0_50, %c0_51], %85 {strides = array<i32>} : memref<1x4x8x16xbf16, #tpu.memory_space<vmem>>, vector<1x1x8x16xbf16>,
    %86 = vector.extract_strided_slice %35 {offsets = [0, 112], sizes = [8, 16], strides = [1, 1]} : vector<8x192xf32> to vector<8x16xf32>
    %87 = arith.truncf %86 : vector<8x16xf32> to vector<8x16xbf16>
    %c0_52 = arith.constant 0 : index
    %c3_53 = arith.constant 3 : index
    %c0_54 = arith.constant 0 : index
    %c0_55 = arith.constant 0 : index
    %88 = vector.load %arg8[%c0_52, %c3_53, %c0_54, %c0_55] : memref<1x4x8x16xbf16, #tpu.memory_space<vmem>>, vector<1x1x8x16xbf16>
    %89 = vector.shape_cast %88 : vector<1x1x8x16xbf16> to vector<8x16xbf16>
    %90 = vector.shape_cast %87 : vector<8x16xbf16> to vector<1x1x8x16xbf16>
    tpu.vector_store %arg8[%c0_52, %c3_53, %c0_54, %c0_55], %90 {strides = array<i32>} : memref<1x4x8x16xbf16, #tpu.memory_space<vmem>>, vector<1x1x8x16xbf16>,
    %91 = vector.extract_strided_slice %35 {offsets = [0, 176], sizes = [8, 16], strides = [1, 1]} : vector<8x192xf32> to vector<8x16xf32>
    %92 = arith.truncf %91 : vector<8x16xf32> to vector<8x16xbf16>
    %c0_56 = arith.constant 0 : index
    %c3_57 = arith.constant 3 : index
    %c0_58 = arith.constant 0 : index
    %c0_59 = arith.constant 0 : index
    %93 = vector.load %arg9[%c0_56, %c3_57, %c0_58, %c0_59] : memref<1x4x8x16xbf16, #tpu.memory_space<vmem>>, vector<1x1x8x16xbf16>
    %94 = vector.shape_cast %93 : vector<1x1x8x16xbf16> to vector<8x16xbf16>
    %95 = vector.shape_cast %92 : vector<8x16xbf16> to vector<1x1x8x16xbf16>
    tpu.vector_store %arg9[%c0_56, %c3_57, %c0_58, %c0_59], %95 {strides = array<i32>} : memref<1x4x8x16xbf16, #tpu.memory_space<vmem>>, vector<1x1x8x16xbf16>,
    return
  }
  func.func @transform_0(%arg0: i32, %arg1: i32) -> (i32, i32, i32) {
    %c0_i32 = arith.constant 0 : i32
    %c0_i32_0 = arith.constant 0 : i32
    return %arg0, %arg1, %c0_i32 : i32, i32, i32
  }
  func.func @transform_1(%arg0: i32, %arg1: i32) -> (i32, i32) {
    %c0_i32 = arith.constant 0 : i32
    %c0_i32_0 = arith.constant 0 : i32
    %c0_i32_1 = arith.constant 0 : i32
    return %c0_i32, %c0_i32_0 : i32, i32
  }
  func.func @transform_2(%arg0: i32, %arg1: i32) -> (i32, i32) {
    %c0_i32 = arith.constant 0 : i32
    %c0_i32_0 = arith.constant 0 : i32
    %c0_i32_1 = arith.constant 0 : i32
    return %c0_i32, %c0_i32_0 : i32, i32
  }
  func.func @transform_3(%arg0: i32, %arg1: i32) -> (i32, i32) {
    %c0_i32 = arith.constant 0 : i32
    %c0_i32_0 = arith.constant 0 : i32
    %c0_i32_1 = arith.constant 0 : i32
    return %c0_i32, %c0_i32_0 : i32, i32
  }
  func.func @transform_4(%arg0: i32, %arg1: i32) -> (i32, i32) {
    %c0_i32 = arith.constant 0 : i32
    %c0_i32_0 = arith.constant 0 : i32
    %c0_i32_1 = arith.constant 0 : i32
    return %c0_i32, %c0_i32_0 : i32, i32
  }
  func.func @transform_5(%arg0: i32, %arg1: i32) -> (i32, i32, i32, i32) {
    %c0_i32 = arith.constant 0 : i32
    %c0_i32_0 = arith.constant 0 : i32
    %c0_i32_1 = arith.constant 0 : i32
    return %arg0, %c0_i32, %arg1, %c0_i32_0 : i32, i32, i32, i32
  }
  func.func @transform_6(%arg0: i32, %arg1: i32) -> (i32, i32, i32, i32) {
    %c0_i32 = arith.constant 0 : i32
    %c0_i32_0 = arith.constant 0 : i32
    %c0_i32_1 = arith.constant 0 : i32
    return %arg0, %c0_i32, %arg1, %c0_i32_0 : i32, i32, i32, i32
  }
  func.func @transform_7(%arg0: i32, %arg1: i32) -> (i32, i32, i32, i32) {
    %c0_i32 = arith.constant 0 : i32
    %c0_i32_0 = arith.constant 0 : i32
    %c0_i32_1 = arith.constant 0 : i32
    return %arg0, %c0_i32, %arg1, %c0_i32_0 : i32, i32, i32, i32
  }
}

module attributes {stable_mosaic.version = 11 : i64} {
  func.func @kernel(%arg0: i32, %arg1: i32, %arg2: memref<1x8x64xf32, #tpu.memory_space<vmem>>, %arg3: memref<1x64xf32, #tpu.memory_space<vmem>>, %arg4: memref<1x64xf32, #tpu.memory_space<vmem>>, %arg5: memref<64x192xbf16, #tpu.memory_space<vmem>>, %arg6: memref<1x192xf32, #tpu.memory_space<vmem>>, %arg7: memref<1x4x8x16xbf16, #tpu.memory_space<vmem>>, %arg8: memref<1x4x8x16xbf16, #tpu.memory_space<vmem>>, %arg9: memref<1x4x8x16xbf16, #tpu.memory_space<vmem>>) attributes {dimension_semantics = [#tpu.dimension_semantics<parallel>, #tpu.dimension_semantics<parallel>], iteration_bounds = array<i64: 2, 4>, scalar_prefetch = 0 : i64, scratch_operands = 0 : i64, tpu.core_type = #tpu.core_type<tc>, window_params = [{transform_indices = @transform_0, window_bounds = array<i64: 1, 8, 64>}, {pipeline_mode = #tpu.pipeline_mode<synchronous>, transform_indices = @transform_1, window_bounds = array<i64: 1, 64>}, {pipeline_mode = #tpu.pipeline_mode<synchronous>, transform_indices = @transform_2, window_bounds = array<i64: 1, 64>}, {pipeline_mode = #tpu.pipeline_mode<synchronous>, transform_indices = @transform_3, window_bounds = array<i64: 64, 192>}, {pipeline_mode = #tpu.pipeline_mode<synchronous>, transform_indices = @transform_4, window_bounds = array<i64: 1, 192>}, {transform_indices = @transform_5, window_bounds = array<i64: 1, 4, 8, 16>}, {transform_indices = @transform_6, window_bounds = array<i64: 1, 4, 8, 16>}, {transform_indices = @transform_7, window_bounds = array<i64: 1, 4, 8, 16>}]} {
    %c0 = arith.constant 0 : index
    %c0_0 = arith.constant 0 : index
    %c0_1 = arith.constant 0 : index
    %0 = vector.load %arg2[%c0, %c0_0, %c0_1] : memref<1x8x64xf32, #tpu.memory_space<vmem>>, vector<1x8x64xf32>
    %1 = vector.shape_cast %0 : vector<1x8x64xf32> to vector<8x64xf32>
    %cst = arith.constant dense<0.000000e+00> : vector<8xf32>
    %2 = vector.multi_reduction <add>, %1, %cst [1] : vector<8x64xf32> to vector<8xf32>
    %3 = vector.shape_cast %2 : vector<8xf32> to vector<8x1xf32>
    %cst_2 = arith.constant 6.400000e+01 : f32
    %4 = vector.broadcast %cst_2 : f32 to vector<8x1xf32>
    %5 = arith.divf %3, %4 : vector<8x1xf32>
    %6 = vector.broadcast %5 : vector<8x1xf32> to vector<8x64xf32>
    %7 = arith.subf %1, %6 : vector<8x64xf32>
    %8 = arith.mulf %7, %7 : vector<8x64xf32>
    %cst_3 = arith.constant dense<0.000000e+00> : vector<8xf32>
    %9 = vector.multi_reduction <add>, %8, %cst_3 [1] : vector<8x64xf32> to vector<8xf32>
    %10 = vector.shape_cast %9 : vector<8xf32> to vector<8x1xf32>
    %cst_4 = arith.constant 6.400000e+01 : f32
    %11 = vector.broadcast %cst_4 : f32 to vector<8x1xf32>
    %12 = arith.divf %10, %11 : vector<8x1xf32>
    %13 = vector.broadcast %5 : vector<8x1xf32> to vector<8x64xf32>
    %14 = arith.subf %1, %13 : vector<8x64xf32>
    %cst_5 = arith.constant 9.99999974E-6 : f32
    %15 = vector.broadcast %cst_5 : f32 to vector<8x1xf32>
    %16 = arith.addf %12, %15 : vector<8x1xf32>
    %17 = math.rsqrt %16 : vector<8x1xf32>
    %18 = vector.broadcast %17 : vector<8x1xf32> to vector<8x64xf32>
    %19 = arith.mulf %14, %18 : vector<8x64xf32>
    %c0_6 = arith.constant 0 : index
    %c0_7 = arith.constant 0 : index
    %20 = vector.load %arg3[%c0_6, %c0_7] : memref<1x64xf32, #tpu.memory_space<vmem>>, vector<1x64xf32>
    %21 = vector.shape_cast %20 : vector<1x64xf32> to vector<64xf32>
    %22 = vector.shape_cast %21 : vector<64xf32> to vector<1x64xf32>
    %23 = vector.broadcast %22 : vector<1x64xf32> to vector<8x64xf32>
    %24 = arith.mulf %19, %23 : vector<8x64xf32>
    %c0_8 = arith.constant 0 : index
    %c0_9 = arith.constant 0 : index
    %25 = vector.load %arg4[%c0_8, %c0_9] : memref<1x64xf32, #tpu.memory_space<vmem>>, vector<1x64xf32>
    %26 = vector.shape_cast %25 : vector<1x64xf32> to vector<64xf32>
    %27 = vector.shape_cast %26 : vector<64xf32> to vector<1x64xf32>
    %28 = vector.broadcast %27 : vector<1x64xf32> to vector<8x64xf32>
    %29 = arith.addf %24, %28 : vector<8x64xf32>
    %30 = arith.truncf %29 : vector<8x64xf32> to vector<8x64xbf16>
    %c0_10 = arith.constant 0 : index
    %c0_11 = arith.constant 0 : index
    %31 = vector.load %arg5[%c0_10, %c0_11] : memref<64x192xbf16, #tpu.memory_space<vmem>>, vector<64x192xbf16>
    %cst_12 = arith.constant dense<0.000000e+00> : vector<8x192xf32>
    %32 = tpu.matmul %30, %31, %cst_12 {dimension_numbers = #tpu.dot_dimension_numbers<[1], [0], [0], [1], [0, 0, 1, 1], [], []>} : vector<8x64xbf16>, vector<64x192xbf16>, vector<8x192xf32> -> vector<8x192xf32>
    %c0_13 = arith.constant 0 : index
    %c0_14 = arith.constant 0 : index
    %33 = vector.load %arg6[%c0_13, %c0_14] : memref<1x192xf32, #tpu.memory_space<vmem>>, vector<1x192xf32>
    %34 = vector.broadcast %33 : vector<1x192xf32> to vector<8x192xf32>
    %35 = arith.addf %32, %34 : vector<8x192xf32>
    %36 = vector.extract_strided_slice %35 {offsets = [0, 0], sizes = [8, 16], strides = [1, 1]} : vector<8x192xf32> to vector<8x16xf32>
    %37 = arith.truncf %36 : vector<8x16xf32> to vector<8x16xbf16>
    %c0_15 = arith.constant 0 : index
    %c0_16 = arith.constant 0 : index
    %c0_17 = arith.constant 0 : index
    %c0_18 = arith.constant 0 : index
    %38 = vector.load %arg7[%c0_15, %c0_16, %c0_17, %c0_18] : memref<1x4x8x16xbf16, #tpu.memory_space<vmem>>, vector<1x1x8x16xbf16>
    %39 = vector.shape_cast %38 : vector<1x1x8x16xbf16> to vector<8x16xbf16>
    %40 = vector.shape_cast %37 : vector<8x16xbf16> to vector<1x1x8x16xbf16>
    tpu.vector_store %arg7[%c0_15, %c0_16, %c0_17, %c0_18], %40 {strides = array<i32>} : memref<1x4x8x16xbf16, #tpu.memory_space<vmem>>, vector<1x1x8x16xbf16>,
    %41 = vector.extract_strided_slice %35 {offsets = [0, 64], sizes = [8, 16], strides = [1, 1]} : vector<8x192xf32> to vector<8x16xf32>
    %42 = arith.truncf %41 : vector<8x16xf32> to vector<8x16xbf16>
    %c0_19 = arith.constant 0 : index
    %c0_20 = arith.constant 0 : index
    %c0_21 = arith.constant 0 : index
    %c0_22 = arith.constant 0 : index
    %43 = vector.load %arg8[%c0_19, %c0_20, %c0_21, %c0_22] : memref<1x4x8x16xbf16, #tpu.memory_space<vmem>>, vector<1x1x8x16xbf16>
    %44 = vector.shape_cast %43 : vector<1x1x8x16xbf16> to vector<8x16xbf16>
    %45 = vector.shape_cast %42 : vector<8x16xbf16> to vector<1x1x8x16xbf16>
    tpu.vector_store %arg8[%c0_19, %c0_20, %c0_21, %c0_22], %45 {strides = array<i32>} : memref<1x4x8x16xbf16, #tpu.memory_space<vmem>>, vector<1x1x8x16xbf16>,
    %46 = vector.extract_strided_slice %35 {offsets = [0, 128], sizes = [8, 16], strides = [1, 1]} : vector<8x192xf32> to vector<8x16xf32>
    %47 = arith.truncf %46 : vector<8x16xf32> to vector<8x16xbf16>
    %c0_23 = arith.constant 0 : index
    %c0_24 = arith.constant 0 : index
    %c0_25 = arith.constant 0 : index
    %c0_26 = arith.constant 0 : index
    %48 = vector.load %arg9[%c0_23, %c0_24, %c0_25, %c0_26] : memref<1x4x8x16xbf16, #tpu.memory_space<vmem>>, vector<1x1x8x16xbf16>
    %49 = vector.shape_cast %48 : vector<1x1x8x16xbf16> to vector<8x16xbf16>
    %50 = vector.shape_cast %47 : vector<8x16xbf16> to vector<1x1x8x16xbf16>
    tpu.vector_store %arg9[%c0_23, %c0_24, %c0_25, %c0_26], %50 {strides = array<i32>} : memref<1x4x8x16xbf16, #tpu.memory_space<vmem>>, vector<1x1x8x16xbf16>,
    %51 = vector.extract_strided_slice %35 {offsets = [0, 16], sizes = [8, 16], strides = [1, 1]} : vector<8x192xf32> to vector<8x16xf32>
    %52 = arith.truncf %51 : vector<8x16xf32> to vector<8x16xbf16>
    %c0_27 = arith.constant 0 : index
    %c1 = arith.constant 1 : index
    %c0_28 = arith.constant 0 : index
    %c0_29 = arith.constant 0 : index
    %53 = vector.load %arg7[%c0_27, %c1, %c0_28, %c0_29] : memref<1x4x8x16xbf16, #tpu.memory_space<vmem>>, vector<1x1x8x16xbf16>
    %54 = vector.shape_cast %53 : vector<1x1x8x16xbf16> to vector<8x16xbf16>
    %55 = vector.shape_cast %52 : vector<8x16xbf16> to vector<1x1x8x16xbf16>
    tpu.vector_store %arg7[%c0_27, %c1, %c0_28, %c0_29], %55 {strides = array<i32>} : memref<1x4x8x16xbf16, #tpu.memory_space<vmem>>, vector<1x1x8x16xbf16>,
    %56 = vector.extract_strided_slice %35 {offsets = [0, 80], sizes = [8, 16], strides = [1, 1]} : vector<8x192xf32> to vector<8x16xf32>
    %57 = arith.truncf %56 : vector<8x16xf32> to vector<8x16xbf16>
    %c0_30 = arith.constant 0 : index
    %c1_31 = arith.constant 1 : index
    %c0_32 = arith.constant 0 : index
    %c0_33 = arith.constant 0 : index
    %58 = vector.load %arg8[%c0_30, %c1_31, %c0_32, %c0_33] : memref<1x4x8x16xbf16, #tpu.memory_space<vmem>>, vector<1x1x8x16xbf16>
    %59 = vector.shape_cast %58 : vector<1x1x8x16xbf16> to vector<8x16xbf16>
    %60 = vector.shape_cast %57 : vector<8x16xbf16> to vector<1x1x8x16xbf16>
    tpu.vector_store %arg8[%c0_30, %c1_31, %c0_32, %c0_33], %60 {strides = array<i32>} : memref<1x4x8x16xbf16, #tpu.memory_space<vmem>>, vector<1x1x8x16xbf16>,
    %61 = vector.extract_strided_slice %35 {offsets = [0, 144], sizes = [8, 16], strides = [1, 1]} : vector<8x192xf32> to vector<8x16xf32>
    %62 = arith.truncf %61 : vector<8x16xf32> to vector<8x16xbf16>
    %c0_34 = arith.constant 0 : index
    %c1_35 = arith.constant 1 : index
    %c0_36 = arith.constant 0 : index
    %c0_37 = arith.constant 0 : index
    %63 = vector.load %arg9[%c0_34, %c1_35, %c0_36, %c0_37] : memref<1x4x8x16xbf16, #tpu.memory_space<vmem>>, vector<1x1x8x16xbf16>
    %64 = vector.shape_cast %63 : vector<1x1x8x16xbf16> to vector<8x16xbf16>
    %65 = vector.shape_cast %62 : vector<8x16xbf16> to vector<1x1x8x16xbf16>
    tpu.vector_store %arg9[%c0_34, %c1_35, %c0_36, %c0_37], %65 {strides = array<i32>} : memref<1x4x8x16xbf16, #tpu.memory_space<vmem>>, vector<1x1x8x16xbf16>,
    %66 = vector.extract_strided_slice %35 {offsets = [0, 32], sizes = [8, 16], strides = [1, 1]} : vector<8x192xf32> to vector<8x16xf32>
    %67 = arith.truncf %66 : vector<8x16xf32> to vector<8x16xbf16>
    %c0_38 = arith.constant 0 : index
    %c2 = arith.constant 2 : index
    %c0_39 = arith.constant 0 : index
    %c0_40 = arith.constant 0 : index
    %68 = vector.load %arg7[%c0_38, %c2, %c0_39, %c0_40] : memref<1x4x8x16xbf16, #tpu.memory_space<vmem>>, vector<1x1x8x16xbf16>
    %69 = vector.shape_cast %68 : vector<1x1x8x16xbf16> to vector<8x16xbf16>
    %70 = vector.shape_cast %67 : vector<8x16xbf16> to vector<1x1x8x16xbf16>
    tpu.vector_store %arg7[%c0_38, %c2, %c0_39, %c0_40], %70 {strides = array<i32>} : memref<1x4x8x16xbf16, #tpu.memory_space<vmem>>, vector<1x1x8x16xbf16>,
    %71 = vector.extract_strided_slice %35 {offsets = [0, 96], sizes = [8, 16], strides = [1, 1]} : vector<8x192xf32> to vector<8x16xf32>
    %72 = arith.truncf %71 : vector<8x16xf32> to vector<8x16xbf16>
    %c0_41 = arith.constant 0 : index
    %c2_42 = arith.constant 2 : index
    %c0_43 = arith.constant 0 : index
    %c0_44 = arith.constant 0 : index
    %73 = vector.load %arg8[%c0_41, %c2_42, %c0_43, %c0_44] : memref<1x4x8x16xbf16, #tpu.memory_space<vmem>>, vector<1x1x8x16xbf16>
    %74 = vector.shape_cast %73 : vector<1x1x8x16xbf16> to vector<8x16xbf16>
    %75 = vector.shape_cast %72 : vector<8x16xbf16> to vector<1x1x8x16xbf16>
    tpu.vector_store %arg8[%c0_41, %c2_42, %c0_43, %c0_44], %75 {strides = array<i32>} : memref<1x4x8x16xbf16, #tpu.memory_space<vmem>>, vector<1x1x8x16xbf16>,
    %76 = vector.extract_strided_slice %35 {offsets = [0, 160], sizes = [8, 16], strides = [1, 1]} : vector<8x192xf32> to vector<8x16xf32>
    %77 = arith.truncf %76 : vector<8x16xf32> to vector<8x16xbf16>
    %c0_45 = arith.constant 0 : index
    %c2_46 = arith.constant 2 : index
    %c0_47 = arith.constant 0 : index
    %c0_48 = arith.constant 0 : index
    %78 = vector.load %arg9[%c0_45, %c2_46, %c0_47, %c0_48] : memref<1x4x8x16xbf16, #tpu.memory_space<vmem>>, vector<1x1x8x16xbf16>
    %79 = vector.shape_cast %78 : vector<1x1x8x16xbf16> to vector<8x16xbf16>
    %80 = vector.shape_cast %77 : vector<8x16xbf16> to vector<1x1x8x16xbf16>
    tpu.vector_store %arg9[%c0_45, %c2_46, %c0_47, %c0_48], %80 {strides = array<i32>} : memref<1x4x8x16xbf16, #tpu.memory_space<vmem>>, vector<1x1x8x16xbf16>,
    %81 = vector.extract_strided_slice %35 {offsets = [0, 48], sizes = [8, 16], strides = [1, 1]} : vector<8x192xf32> to vector<8x16xf32>
    %82 = arith.truncf %81 : vector<8x16xf32> to vector<8x16xbf16>
    %c0_49 = arith.constant 0 : index
    %c3 = arith.constant 3 : index
    %c0_50 = arith.constant 0 : index
    %c0_51 = arith.constant 0 : index
    %83 = vector.load %arg7[%c0_49, %c3, %c0_50, %c0_51] : memref<1x4x8x16xbf16, #tpu.memory_space<vmem>>, vector<1x1x8x16xbf16>
    %84 = vector.shape_cast %83 : vector<1x1x8x16xbf16> to vector<8x16xbf16>
    %85 = vector.shape_cast %82 : vector<8x16xbf16> to vector<1x1x8x16xbf16>
    tpu.vector_store %arg7[%c0_49, %c3, %c0_50, %c0_51], %85 {strides = array<i32>} : memref<1x4x8x16xbf16, #tpu.memory_space<vmem>>, vector<1x1x8x16xbf16>,
    %86 = vector.extract_strided_slice %35 {offsets = [0, 112], sizes = [8, 16], strides = [1, 1]} : vector<8x192xf32> to vector<8x16xf32>
    %87 = arith.truncf %86 : vector<8x16xf32> to vector<8x16xbf16>
    %c0_52 = arith.constant 0 : index
    %c3_53 = arith.constant 3 : index
    %c0_54 = arith.constant 0 : index
    %c0_55 = arith.constant 0 : index
    %88 = vector.load %arg8[%c0_52, %c3_53, %c0_54, %c0_55] : memref<1x4x8x16xbf16, #tpu.memory_space<vmem>>, vector<1x1x8x16xbf16>
    %89 = vector.shape_cast %88 : vector<1x1x8x16xbf16> to vector<8x16xbf16>
    %90 = vector.shape_cast %87 : vector<8x16xbf16> to vector<1x1x8x16xbf16>
    tpu.vector_store %arg8[%c0_52, %c3_53, %c0_54, %c0_55], %90 {strides = array<i32>} : memref<1x4x8x16xbf16, #tpu.memory_space<vmem>>, vector<1x1x8x16xbf16>,
    %91 = vector.extract_strided_slice %35 {offsets = [0, 176], sizes = [8, 16], strides = [1, 1]} : vector<8x192xf32> to vector<8x16xf32>
    %92 = arith.truncf %91 : vector<8x16xf32> to vector<8x16xbf16>
    %c0_56 = arith.constant 0 : index
    %c3_57 = arith.constant 3 : index
    %c0_58 = arith.constant 0 : index
    %c0_59 = arith.constant 0 : index
    %93 = vector.load %arg9[%c0_56, %c3_57, %c0_58, %c0_59] : memref<1x4x8x16xbf16, #tpu.memory_space<vmem>>, vector<1x1x8x16xbf16>
    %94 = vector.shape_cast %93 : vector<1x1x8x16xbf16> to vector<8x16xbf16>
    %95 = vector.shape_cast %92 : vector<8x16xbf16> to vector<1x1x8x16xbf16>
    tpu.vector_store %arg9[%c0_56, %c3_57, %c0_58, %c0_59], %95 {strides = array<i32>} : memref<1x4x8x16xbf16, #tpu.memory_space<vmem>>, vector<1x1x8x16xbf16>,
    return
  }
  func.func @transform_0(%arg0: i32, %arg1: i32) -> (i32, i32, i32) {
    %c0_i32 = arith.constant 0 : i32
    %c0_i32_0 = arith.constant 0 : i32
    return %arg0, %arg1, %c0_i32 : i32, i32, i32
  }
  func.func @transform_1(%arg0: i32, %arg1: i32) -> (i32, i32) {
    %c0_i32 = arith.constant 0 : i32
    %c0_i32_0 = arith.constant 0 : i32
    %c0_i32_1 = arith.constant 0 : i32
    return %c0_i32, %c0_i32_0 : i32, i32
  }
  func.func @transform_2(%arg0: i32, %arg1: i32) -> (i32, i32) {
    %c0_i32 = arith.constant 0 : i32
    %c0_i32_0 = arith.constant 0 : i32
    %c0_i32_1 = arith.constant 0 : i32
    return %c0_i32, %c0_i32_0 : i32, i32
  }
  func.func @transform_3(%arg0: i32, %arg1: i32) -> (i32, i32) {
    %c0_i32 = arith.constant 0 : i32
    %c0_i32_0 = arith.constant 0 : i32
    %c0_i32_1 = arith.constant 0 : i32
    return %c0_i32, %c0_i32_0 : i32, i32
  }
  func.func @transform_4(%arg0: i32, %arg1: i32) -> (i32, i32) {
    %c0_i32 = arith.constant 0 : i32
    %c0_i32_0 = arith.constant 0 : i32
    %c0_i32_1 = arith.constant 0 : i32
    return %c0_i32, %c0_i32_0 : i32, i32
  }
  func.func @transform_5(%arg0: i32, %arg1: i32) -> (i32, i32, i32, i32) {
    %c0_i32 = arith.constant 0 : i32
    %c0_i32_0 = arith.constant 0 : i32
    %c0_i32_1 = arith.constant 0 : i32
    return %arg0, %c0_i32, %arg1, %c0_i32_0 : i32, i32, i32, i32
  }
  func.func @transform_6(%arg0: i32, %arg1: i32) -> (i32, i32, i32, i32) {
    %c0_i32 = arith.constant 0 : i32
    %c0_i32_0 = arith.constant 0 : i32
    %c0_i32_1 = arith.constant 0 : i32
    return %arg0, %c0_i32, %arg1, %c0_i32_0 : i32, i32, i32, i32
  }
  func.func @transform_7(%arg0: i32, %arg1: i32) -> (i32, i32, i32, i32) {
    %c0_i32 = arith.constant 0 : i32
    %c0_i32_0 = arith.constant 0 : i32
    %c0_i32_1 = arith.constant 0 : i32
    return %arg0, %c0_i32, %arg1, %c0_i32_0 : i32, i32, i32, i32
  }
}

</mosaic_0001>

<bundles_post_ra>
// kernel: tpu_custom_call.1
= control target key start
LH: loop header
LB: loop body
LE: loop exit
PB: predicated region body
PF: predicated region fallthrough
CT: control target
= control target key end

     0   :  { %s1520_s0 = inlined_call_operand.hbm [shape: f32[2,32,64], index: 0, kind: input, shape index: {}]   ;;  %s1521_s1 = inlined_call_operand.vmem [shape: f32[1,64], index: 1, kind: input, shape index: {}]   ;;  %s1522_s2 = inlined_call_operand.hbm [shape: f32[1,64], index: 2, kind: input, shape index: {}]   ;;  %s1523_s3 = inlined_call_operand.hbm [shape: bf16[64,192], index: 3, kind: input, shape index: {}]   ;;  %s1524_s4 = inlined_call_operand.vmem [shape: f32[1,192], index: 4, kind: input, shape index: {}]   ;;  %s1525_s5 = inlined_call_operand.vmem [shape: bf16[2,4,32,16], index: 5, kind: output, shape index: {0}]   ;;  %s1526_s6 = inlined_call_operand.vmem [shape: bf16[2,4,32,16], index: 6, kind: output, shape index: {1}]   ;;  %s1527_s7 = inlined_call_operand.vmem [shape: bf16[2,4,32,16], index: 7, kind: output, shape index: {2}]  }
   0x1   :  { %1533 = sst [smem:[#allocation14_spill]] %s1522_s2 }
   0x2   :  { %1534 = sst [smem:[#allocation15_spill]] %s1523_s3 }
   0x3   :  { %1535 = sst [smem:[#allocation16_spill]] %s1525_s5 }
   0x4   :  { %1536 = sst [smem:[#allocation17_spill]] %s1526_s6 }
   0x5   :  { %1537 = sst [smem:[#allocation18_spill]] %s1527_s7 }
   0x6   :  { %13 = vsyncpa [#allocation3], 0 }
   0x7   :  { %15 = vsyncpa [#allocation3 + $0x1], 0 }
   0x8   :  { %16 = vsyncpa [#allocation5], 0  ;;  %s1270_s24 = smov 0   ;;  %s1272_s25 = smov 0  }
   0x9   :  { %s1274_s26 = smov 0   ;;  %s1276_s27 = smov 0  }
   0xa   :  { %s1278_s28 = smov 0   ;;  %s1280_s29 = smov 0  }
   0xb   :  { %s1282_s30 = smov 0   ;;  %s1284_s8 = smov 0  }
   0xc LB: > { %1538 = sst [smem:[#allocation12_spill]] %s1199_s27  ;;  %s898_s9 = sadd.s32 4294967295, %s1215_s8   ;;  %s1215_s8 = sphi %s1284_s8, %s22_s8   ;;  %s1211_s30 = sphi %s1282_s30, %s1567_s30   ;;  %s1207_s29 = sphi %s1280_s29, %s1566_s29   ;;  %s1203_s28 = sphi %s1278_s28, %s1565_s28   ;;  %s1199_s27 = sphi %s1276_s27, %s1564_s27   ;;  %s1195_s26 = sphi %s1274_s26, %s1563_s26   ;;  %s1191_s25 = sphi %s1272_s25, %s1562_s25   ;;  %s1187_s24 = sphi %s1270_s24, %s1561_s24  }
   0xd   : > { %p56_p0 = scmp.ne.s32.totalorder %s1191_s25, %s1187_s24  ;;  %p1310_p1 = scmp.eq.s32.totalorder %s898_s9, 0 }
   0xe   : > { %p1314_p2 = scmp.eq.s32.totalorder %s898_s9, 7  ;;  %p900_p3 = scmp.ge.s32.totalorder %s1215_s8, 1 }
   0xf   : > { %s1539_s10 = scalar_select %p1310_p1, 1, 0 }
  0x10   : > { %s1540_s11 = scalar_select %p1314_p2, 1, 0 }
  0x11   : > { %p235_p4 = scmp.lt.s32.totalorder %s1215_s8, 9  ;;  %p1322_p5 = por %p1310_p1, %p56_p0 }
  0x12   : > { %s1217_s14 = smov [#allocation4]   ;;  %s1218_s17 = smov [#allocation6]  }
  0x13   : > { %s1541_s12 = scalar_select %p1322_p5, 1, 0 }
  0x14   : > { %p1326_p6 = pnand %p900_p3, %p235_p4  ;;  %s251_s15 = sshll.u32 %s1217_s14, 4  ;;  %s252_s15 = int_to_ptr.vmem [resolvable:$true] %s251_s15 }
  0x15   : > { %s261_s18 = sshll.u32 %s1218_s17, 4  ;;  %s1076_s19 = scalar_lea.vmem %s252_s15, 16  ;;  %s262_s18 = int_to_ptr.vmem [resolvable:$true] %s261_s18 }
  0x16   : > { %s1542_s13 = scalar_select %p1326_p6, 1, 0 }
  0x17   : > { %p959_p7 = pneg %p1326_p6  ;;  %p1077_p10 = scmp.ne.s32.totalorder %s252_s15, %s1076_s19 }
  0x18   : > { %s1083_s20 = scalar_lea.vmem %s252_s15, 32  ;;  %p1084_p13 = scmp.lt.s32.totalorder %s252_s15, %s252_s15 }
  0x19   : > { %p1334_p8 = pnand %p959_p7, %p1310_p1  ;;  %p1085_p0 = scmp.lt.s32.totalorder %s1083_s20, %s1076_s19 }
  0x1b   : > { %p1067_p9 = pneg %p1334_p8  ;;  %p1086_p3 = por %p1085_p0, %p1084_p13 }
  0x1d   : > { %p1079_p11 = pnand %p1077_p10, %p1067_p9 }
  0x1f   : > { %p1080_p12 = pneg %p1079_p11 }
  0x21   : > { %p1087_p4 = pnand %p1086_p3, %p1080_p12 }
  0x23   : > { %1090 = shalt.err (!%p1087_p4)
}
  0x24   : > { %s1544_s2 = sld [smem:[#allocation14_spill]]  ;;  %s1102_s23 = scalar_lea.vmem %s262_s18, 1024 }
  0x25   : > { %p1103_p7 = scmp.ne.s32.totalorder %s262_s18, %s1102_s23  ;;  %p1110_p11 = scmp.lt.s32.totalorder %s262_s18, %s262_s18 }
  0x26   : > { %p1111_p5 = scmp.lt.s32.totalorder %s1102_s23, %s1102_s23 }
  0x27   : > { %p1105_p1 = pnand %p1103_p7, %p1067_p9 }
  0x28   : > { %p1112_p6 = por %p1111_p5, %p1110_p11 }
  0x29   : > { %p1106_p10 = pneg %p1105_p1 }
  0x2a   : > { %962 = dma.hbm_to_vmem [thread:$0]  (!%p1334_p8), %s1544_s2, 16, %s252_s15, [#allocation5]  }
  0x2b   : > { %p1113_p2 = pnand %p1112_p6, %p1106_p10 }
  0x2d   : > { %1116 = shalt.err (!%p1113_p2)
}
  0x2e   : > { %s1219_s24 = smov 128   ;;  %s1220_s9 = smov 8  }
  0x2f   : > { %s1545_s3 = sld [smem:[#allocation15_spill]]  ;;  %s31_s17 = sadd.s32 1, %s1207_s29 }
  0x30   : > { %p32_p1 = scmp.ge.s32.totalorder %s31_s17, 4  ;;  %s34_s19 = sadd.s32 1, %s1211_s30 }
  0x31   : > { %s43_s20 = sadd.s32 1, %s1195_s26  ;;  %p50_p2 = scmp.ne.s32.totalorder %s1195_s26, %s1191_s25 }
  0x32   : > { %s1569_s17 = smov (%p32_p1, %s31_s17), 0  ;;  %s1571_s19 = smov (!%p32_p1, %s34_s19), %s1211_s30 }
  0x33   : > { %1546 = sst [smem:[#allocation13_spill]] %s1569_s17  ;;  %s39_s21 = ssub.s32 %s1207_s29, %s1569_s17 }
  0x34   : > { %p51_p5 = scmp.eq.s32.totalorder %s1215_s8, 0  ;;  %p36_p6 = scmp.ge.s32.totalorder %s1571_s19, 2 }
  0x35   : > { %965 = dma.hbm_to_vmem [thread:$0]  (!%p1334_p8), %s1545_s3, 1024, %s262_s18, [#allocation5], %s1219_s24, %s1219_s24, %s1220_s9  }
  0x36   : > { %p1547_p9 = scmp.ne.s32.totalorder %s1540_s11, 0  ;;  %p1373_p8 = por %p51_p5, %p50_p2 }
  0x37   : > { %p972_p13 = scmp.lt.s32.totalorder %s1215_s8, 8  ;;  %s1573_s19 = smov (%p36_p6, %s1571_s19), 0 }
  0x38   : > { %p1369_p12 = por %p1547_p9, %p50_p2  ;;  %s278_s22 = sand.u32 1, %s1195_s26  }
  0x39   : > { %s905_s23 = sshll.u32 %s1211_s30, 2  ;;  %s38_s24 = ssub.s32 %s1211_s30, %s1573_s19 }
  0x3a   : > { %s40_s9 = sor.u32 %s39_s21, %s38_s24  ;;  %s904_s14 = sshll.u32 %s278_s22, 3 }
  0x3b   : > { %p41_p0 = scmp.eq.s32.totalorder %s40_s9, 0  ;;  %s287_s11 = sadd.s32 %s1207_s29, %s905_s23 }
  0x3c   : > { %s282_s15 = scalar_lea.vmem [#allocation2], %s904_s14  ;;  %s906_s17 = sshll.u32 %s287_s11, 7 }
  0x3d   : > { %s291_s2 = sshll.u32 %s282_s15, 4  ;;  %s289_s5 = scalar_lea.hbm %s1520_s0, %s906_s17  ;;  %s292_s2 = int_to_ptr.vmem [resolvable:$true] %s291_s2 }
  0x3e   : > { %s1386_s3 = scalar_select %p41_p0, %s1195_s26, %s43_s20  }
  0x3f   : > { %p1395_p3 = pnand %p972_p13, %p1373_p8  ;;  %s279_s21 = scalar_lea.sflag [#allocation3], %s278_s22 }
  0x40   : > { %s1130_s23 = scalar_lea.vmem %s292_s2, 128  ;;  %s1221_s20 = smov [#allocation2]  }
  0x41   : > { %p1119_p4 = pneg %p1395_p3  ;;  %p1131_p7 = scmp.ne.s32.totalorder %s292_s2, %s1130_s23 }
  0x42   : > { %s1135_s24 = sshll.u32 %s1221_s20, 4  ;;  %s1136_s24 = int_to_ptr.vmem [resolvable:$false] %s1135_s24 }
  0x43   : > { %p1133_p10 = pnand %p1131_p7, %p1119_p4  ;;  %s1137_s9 = scalar_lea.vmem %s1136_s24, 256 }
  0x44   : > { %p1138_p1 = scmp.lt.s32.totalorder %s292_s2, %s1136_s24  ;;  %p1139_p2 = scmp.lt.s32.totalorder %s1137_s9, %s1130_s23 }
  0x45   : > { %p1134_p11 = pneg %p1133_p10 }
  0x46   : > { %p1140_p5 = por %p1139_p2, %p1138_p1 }
  0x48   : > { %p1141_p6 = pnand %p1140_p5, %p1134_p11 }
  0x4a   : > { %1144 = shalt.err (!%p1141_p6)
}
  0x4b   : > { %969 = dma.hbm_to_vmem [thread:$0]  (!%p1395_p3), %s289_s5, 128, %s292_s2, %s279_s21  }
  0x4c   : > { %p1551_p9 = scmp.ne.s32.totalorder %s1542_s13, 0 }
  0x4d   : > { %s1406_s6 = sand.u32 (!%p1551_p9), 1, %s1191_s25   ;;  %p1552_p8 = scmp.ne.s32.totalorder (!%p1551_p9), %s1541_s12, 0 }
  0x4e   : > { %300 = sbr.rel (%p1551_p9) target bundleno = 761 (0x2f9), region = 40  ;;  %s908_s7 = sshll.u32 (!%p1551_p9), %s1406_s6, 3 }
  0x4f   : > { %s303_s17 = scalar_lea.sflag (!%p1551_p9), [#allocation3], %s1406_s6  ;;  %s306_s18 = scalar_lea.vmem (!%p1551_p9), [#allocation2], %s908_s7 }
  0x53   : > { %1178 = dma.done.wait (%p1552_p8), %s303_s17, 128  }
  0x54   : > { %1180 = vsyncadd (%p1552_p8), %s303_s17, 4294967168  ;;  %p1553_p13 = scmp.ne.s32.totalorder %s1539_s10, 0 }
  0x56   : > { %1182 = dma.done.wait (%p1553_p13), [#allocation5], 1040  }
  0x57   : > { %1184 = vsyncadd (%p1553_p13), [#allocation5], 4294966256  ;;  %vm354_vm0 = vcmask 523264   ;;  %v353_v0 = vld [vmem:[%s306_s18] sm:$0xff]  ;;  %v1056_v10 = vld [vmem:[#allocation6 + $0x20] ss:$8 sps:$4 sm:$0xff]   ;;  %v396_v26 = vlaneseq }
  0x58   : > { %v355_v1 = vsel %vm354_vm0, %v353_v0, 0.0  ;;  %v1051_v7 = vld [vmem:[#allocation6 + $0x34] ss:$8 sps:$4 sm:$0xff]   ;;  %v1053_v8 = vld [vmem:[#allocation6 + $0x30] ss:$8 sps:$4 sm:$0xff]   ;;  %v1222_v11 = vmov 0  }
  0x59   : > { %356 = vadd.xlane.f32.xlu0 %v355_v1  ;;  %v1054_v9 = vld [vmem:[#allocation6 + $0x24] ss:$8 sps:$4 sm:$0xff]   ;;  %457 = vmatprep.subr.bf16.mxu0 %v1051_v7  ;;  %v1057_v12 = vld [vmem:[#allocation6 + $0x14] ss:$8 sps:$4 sm:$0xff]   ;;  %v1059_v13 = vld [vmem:[#allocation6 + $0x10] ss:$8 sps:$4 sm:$0xff]  }
  0x5a   : > { %458 = vmatpush1.bf16.msra.mxu0 %v1053_v8  ;;  %481 = vmatprep.mubr.bf16.mxu0 %v1222_v11  ;;  %v1060_v14 = vld [vmem:[#allocation6 + $0x4] ss:$8 sps:$4 sm:$0xff]   ;;  %v1062_v15 = vld [vmem:[#allocation6] ss:$8 sps:$4 sm:$0xff]   ;;  %v915_v22 = vld [vmem:[#allocation4] ss:$0 sm:$0xff] }
  0x5b   : > { %459 = vmatprep.subr.bf16.mxu0 %v1054_v9  ;;  %v914_v20 = vld [vmem:[%s1521_s1] ss:$0 sm:$0xff]  ;;  %v397_v27 = vshrl.u32 %v396_v26, 7  ;;  %s1428_s12 = sshll.u32 %s1406_s6, 4  ;;  %vm491_vm1 = vcmask 125952   ;;  %s1223_s13 = smov 48  }
  0x5c   : > { %v394_v29 = vld [vmem:[%s1524_s4] sm:$0x3]  ;;  %s1224_s22 = smov 64   ;;  %s1431_s14 = scalar_lea.vmem [#allocation7], %s1428_s12 }
  0x5d   : > { %v398_v28 = vsub.s32 0, %v397_v27  ;;  %v402_v30 = vsub.s32 1, %v397_v27  ;;  %s1436_s11 = scalar_lea.vmem [#allocation9], %s1428_s12  ;;  %s1225_s15 = smov 80  }
  0x5e   : > { %460 = vmatpush1.bf16.msra.mxu0 %v1056_v10  ;;  %s1226_s21 = smov 112   ;;  %s1227_s23 = smov 96  }
  0x5f   : > { %461 = vmatprep.subr.bf16.mxu0 %v1057_v12  ;;  %v399_v31 = vrot.slane %v394_v29, %v398_v28  ;;  %v403_v32 = vrot.slane %v394_v29, %v402_v30  ;;  %s1228_s20 = smov 32   ;;  %s1229_s24 = smov 16  }
  0x60   : > { %s1441_s9 = scalar_lea.vmem [#allocation8], %s1428_s12  ;;  %s1554_s6 = sld [smem:[#allocation12_spill]] (%p1369_p12) }
  0x61   : > { %s939_s7 = sshll.u32 (%p1369_p12), %s1203_s28, 4  ;;  %s1555_s27 = sld [smem:[#allocation16_spill]] (%p1369_p12) }
  0x62   : > { %462 = vmatpush1.bf16.msra.mxu0 %v1059_v13 }
  0x63   : > { %463 = vmatprep.subr.bf16.mxu0 %v1060_v14 }
  0x66   : > { %464 = vmatpush1.bf16.msra.mxu0 %v1062_v15  ;;  %s566_s17 = sadd.s32 (%p1369_p12), %s1554_s6, %s939_s7 }
  0x67   : > { %s940_s18 = sshll.u32 (%p1369_p12), %s566_s17, 2 }
  0x68   : > { %s568_s10 = scalar_lea.vmem (%p1369_p12), %s1555_s27, %s940_s18 }
  0xe2   : > { %v357_v2 = vpop.xlane.xlu0 %356 }
  0xe3   : > { %v359_v3 = vmul.f32 0.015625, %v357_v2 }
  0xe5   : > { %v360_v4 = vsub.f32 %v353_v0, %v359_v3 }
  0xe7   : > { %v361_v5 = vmul.f32 %v360_v4, %v360_v4 }
  0xe9   : > { %v362_v6 = vsel %vm354_vm0, %v361_v5, 0.0 }
  0xea   : > { %363 = vadd.xlane.f32.xlu0 %v362_v6 }
 0x173   : > { %v364_v16 = vpop.xlane.xlu0 %363 }
 0x174   : > { %v365_v17 = vmul.f32 0.015625, %v364_v16 }
 0x176   : > { %v366_v18 = vadd.f32 1e-05, %v365_v17 }
 0x178   : > { %1063 = vrsqrt.f32 %v366_v18 }
 0x185   : > { %v1064_v19 = vpop.eup %1063 }
 0x186   : > { %v368_v21 = vmul.f32 %v1064_v19, %v360_v4 }
 0x188   : > { %v376_v23 = vmul.f32 %v914_v20, %v368_v21 }
 0x18a   : > { %v384_v24 = vadd.f32 %v915_v22, %v376_v23 }
 0x18c   : > { %v385_v25 = vpack.c.bf16 %v384_v24, %v384_v24 }
 0x18e   : > { %924 = vmatmul.mubr.msk.bf16.vlgmr.msra.gmra.mxu0 %vm354_vm0, %v385_v25 }
 0x24e   : > { %v483_v33 = vpop.f32.mrf.mxu0 }
 0x24f   : > { %v484_v34 = vadd.f32 %v483_v33, %v399_v31 }
 0x250   : > { %v485_v35 = vpop.f32.mrf.mxu0 }
 0x251   : > { %v490_v36 = vpack.c.bf16 %v484_v34, %v484_v34  ;;  %v486_v37 = vadd.f32 %v485_v35, %v403_v32 }
 0x252   : > { %v487_v38 = vpop.f32.mrf.mxu0 }
 0x253   : > { %v500_v39 = vpack.c.bf16 %v486_v37, %v486_v37  ;;  %507 = vrot.lane.b32.xlu0 %v490_v36, %s1223_s13  ;;  %496 = vrot.lane.b32.xlu1 %v490_v36, %s1224_s22  ;;  %492 = vst.msk [vmem:[%s1431_s14] sm:$0xf] %vm491_vm1, %v490_v36 }
 0x254   : > { %v488_v40 = vpop.f32.mrf.mxu0 }
 0x255   : > { %501 = vst.msk [vmem:[%s1436_s11] sm:$0xf] %vm491_vm1, %v500_v39 }
 0x257   : > { %545 = vrot.lane.b32.xlu0 %v500_v39, %s1225_s15  ;;  %502 = vrot.lane.b32.xlu1 %v490_v36, %s1226_s21 }
 0x25a   : > { %v585_v51 = vld [vmem:[%s1431_s14] sm:$0xf] (%p1369_p12) }
 0x25b   : > { %520 = vrot.lane.b32.xlu1 %v490_v36, %s1227_s23  ;;  %586 = vst [vmem:[%s568_s10] sm:$0xf] (%p1369_p12), %v585_v51 }
 0x25f   : > { %525 = vrot.lane.b32.xlu1 %v490_v36, %s1228_s20 }
 0x263   : > { %535 = vrot.lane.b32.xlu1 %v490_v36, %s1225_s15 }
 0x267   : > { %515 = vrot.lane.b32.xlu1 %v500_v39, %s1226_s21 }
 0x26b   : > { %530 = vrot.lane.b32.xlu1 %v500_v39, %s1227_s23 }
 0x26f   : > { %540 = vrot.lane.b32.xlu1 %v490_v36, %s1229_s24 }
 0x2c5   : > { %v508_v41 = vpop.permute.xlu0 %507  ;;  %v497_v42 = vpop.permute.xlu1 %496 }
 0x2c6   : > { %927 = vst.msk [vmem:[%s1441_s9 + $0x4] sm:$0xf] %vm491_vm1, %v508_v41  ;;  %499 = vst.msk [vmem:[%s1441_s9] sm:$0xf] %vm491_vm1, %v497_v42 }
 0x2c9   : > { %v546_v43 = vpop.permute.xlu0 %545  ;;  %v503_v44 = vpop.permute.xlu1 %502 }
 0x2ca   : > { %935 = vst.msk [vmem:[%s1436_s11 + $0xc] sm:$0xf] %vm491_vm1, %v546_v43  ;;  %926 = vst.msk [vmem:[%s1431_s14 + $0x4] sm:$0xf] %vm491_vm1, %v503_v44 }
 0x2cd   : > { %v521_v45 = vpop.permute.xlu1 %520 }
 0x2ce   : > { %930 = vst.msk [vmem:[%s1431_s14 + $0x8] sm:$0xf] %vm491_vm1, %v521_v45 }
 0x2d1   : > { %v526_v46 = vpop.permute.xlu1 %525  ;;  %v587_v52 = vld [vmem:[%s1431_s14 + $0x4] sm:$0xf] (%p1369_p12) }
 0x2d2   : > { %931 = vst.msk [vmem:[%s1441_s9 + $0x8] sm:$0xf] %vm491_vm1, %v526_v46  ;;  %588 = vst [vmem:[%s568_s10 + $0x10] sm:$0xf] (%p1369_p12), %v587_v52 }
 0x2d5   : > { %v536_v47 = vpop.permute.xlu1 %535  ;;  %v589_v53 = vld [vmem:[%s1431_s14 + $0x8] sm:$0xf] (%p1369_p12) }
 0x2d6   : > { %933 = vst.msk [vmem:[%s1431_s14 + $0xc] sm:$0xf] %vm491_vm1, %v536_v47  ;;  %590 = vst [vmem:[%s568_s10 + $0x20] sm:$0xf] (%p1369_p12), %v589_v53 }
 0x2d9   : > { %v516_v48 = vpop.permute.xlu1 %515 }
 0x2da   : > { %929 = vst.msk [vmem:[%s1436_s11 + $0x4] sm:$0xf] %vm491_vm1, %v516_v48 }
 0x2dd   : > { %v531_v49 = vpop.permute.xlu1 %530  ;;  %v591_v54 = vld [vmem:[%s1431_s14 + $0xc] sm:$0xf] (%p1369_p12) }
 0x2de   : > { %932 = vst.msk [vmem:[%s1436_s11 + $0x8] sm:$0xf] %vm491_vm1, %v531_v49  ;;  %564 = sbr.rel (!%p1369_p12) target bundleno = 739 (0x2e3), region = 56  ;;  %592 = vst [vmem:[%s568_s10 + $0x30] sm:$0xf] (%p1369_p12), %v591_v54 }
 0x2e1   : > { %v541_v50 = vpop.permute.xlu1 %540 }
 0x2e2   : > { %934 = vst.msk [vmem:[%s1441_s9 + $0xc] sm:$0xf] %vm491_vm1, %v541_v50 }
 0x2e3 PF: > { %624 = sbr.rel (!%p1369_p12) target bundleno = 750 (0x2ee), region = 97  ;;  %s1556_s12 = sld [smem:[#allocation12_spill]] (%p1369_p12)  ;;  %v645_v55 = vld [vmem:[%s1441_s9] sm:$0xf] (%p1369_p12)  ;;  %v647_v56 = vld [vmem:[%s1441_s9 + $0x4] sm:$0xf] (%p1369_p12) }
 0x2e4   : > { %s941_s13 = sshll.u32 (%p1369_p12), %s1203_s28, 4  ;;  %v649_v57 = vld [vmem:[%s1441_s9 + $0x8] sm:$0xf] (%p1369_p12)  ;;  %s1557_s23 = sld [smem:[#allocation17_spill]] (%p1369_p12) }
 0x2e9   : > { %s626_s22 = sadd.s32 %s1556_s12, %s941_s13  ;;  %v651_v58 = vld [vmem:[%s1441_s9 + $0xc] sm:$0xf] }
 0x2ea   : > { %s942_s14 = sshll.u32 %s626_s22, 2 }
 0x2eb   : > { %s628_s20 = scalar_lea.vmem %s1557_s23, %s942_s14 }
 0x2ec   : > { %646 = vst [vmem:[%s628_s20] sm:$0xf] %v645_v55  ;;  %648 = vst [vmem:[%s628_s20 + $0x10] sm:$0xf] %v647_v56 }
 0x2ed   : > { %650 = vst [vmem:[%s628_s20 + $0x20] sm:$0xf] %v649_v57  ;;  %652 = vst [vmem:[%s628_s20 + $0x30] sm:$0xf] %v651_v58 }
 0x2ee PF: > { %684 = sbr.rel (!%p1369_p12) target bundleno = 761 (0x2f9), region = 138  ;;  %s1558_s24 = sld [smem:[#allocation12_spill]] (%p1369_p12)  ;;  %v705_v59 = vld [vmem:[%s1436_s11] sm:$0xf] (%p1369_p12)  ;;  %v707_v60 = vld [vmem:[%s1436_s11 + $0x4] sm:$0xf] (%p1369_p12) }
 0x2ef   : > { %s943_s9 = sshll.u32 (%p1369_p12), %s1203_s28, 4  ;;  %v709_v61 = vld [vmem:[%s1436_s11 + $0x8] sm:$0xf] (%p1369_p12)  ;;  %v711_v62 = vld [vmem:[%s1436_s11 + $0xc] sm:$0xf] (%p1369_p12)  ;;  %s1559_s2 = sld [smem:[#allocation18_spill]] (%p1369_p12) }
 0x2f4   : > { %s686_s6 = sadd.s32 %s1558_s24, %s943_s9 }
 0x2f5   : > { %s944_s7 = sshll.u32 %s686_s6, 2 }
 0x2f6   : > { %s688_s5 = scalar_lea.vmem %s1559_s2, %s944_s7 }
 0x2f7   : > { %706 = vst [vmem:[%s688_s5] sm:$0xf] %v705_v59  ;;  %708 = vst [vmem:[%s688_s5 + $0x10] sm:$0xf] %v707_v60 }
 0x2f8   : > { %710 = vst [vmem:[%s688_s5 + $0x20] sm:$0xf] %v709_v61  ;;  %712 = vst [vmem:[%s688_s5 + $0x30] sm:$0xf] %v711_v62 }
 0x2f9 PF: > { %s22_s8 = sadd.s32 1, %s1215_s8   ;;  %s1560_s16 = sld [smem:[#allocation13_spill]] }
 0x2fa   : > { %p19_p12 = scmp.ge.s32.totalorder %s22_s8, 10   ;;  %s1561_s24 = smov %s1191_s25 }
 0x2fb   : > { %s1562_s25 = smov %s1195_s26  ;;  %s1563_s26 = smov %s1386_s3 }
 0x2fc   : > { %s1564_s27 = smov %s1207_s29  ;;  %s1565_s28 = smov %s1211_s30 }
 0x2fd   : > { %s1567_s30 = smov %s1573_s19  ;;  %21 = sbr.rel (!%p19_p12) target bundleno = 12 (0xc), region = 244 }
 0x2ff   : > { %s1566_s29 = smov %s1560_s16 }
 0x302   :  { %768 = vsyncpa [#allocation3], 1 }
 0x303   :  { %770 = vsyncpa [#allocation3 + $0x1], 1 }
 0x304   :  { %771 = vsyncpa [#allocation5], 1 }

// kernel: tpu_custom_call.1
= control target key start
LH: loop header
LB: loop body
LE: loop exit
PB: predicated region body
PF: predicated region fallthrough
CT: control target
= control target key end

     0   :  { %s1520_s0 = inlined_call_operand.hbm [shape: f32[2,32,64], index: 0, kind: input, shape index: {}]   ;;  %s1521_s1 = inlined_call_operand.vmem [shape: f32[1,64], index: 1, kind: input, shape index: {}]   ;;  %s1522_s2 = inlined_call_operand.hbm [shape: f32[1,64], index: 2, kind: input, shape index: {}]   ;;  %s1523_s3 = inlined_call_operand.hbm [shape: bf16[64,192], index: 3, kind: input, shape index: {}]   ;;  %s1524_s4 = inlined_call_operand.vmem [shape: f32[1,192], index: 4, kind: input, shape index: {}]   ;;  %s1525_s5 = inlined_call_operand.vmem [shape: bf16[2,4,32,16], index: 5, kind: output, shape index: {0}]   ;;  %s1526_s6 = inlined_call_operand.vmem [shape: bf16[2,4,32,16], index: 6, kind: output, shape index: {1}]   ;;  %s1527_s7 = inlined_call_operand.vmem [shape: bf16[2,4,32,16], index: 7, kind: output, shape index: {2}]  }
   0x1   :  { %1533 = sst [smem:[#allocation14_spill]] %s1522_s2 }
   0x2   :  { %1534 = sst [smem:[#allocation15_spill]] %s1523_s3 }
   0x3   :  { %1535 = sst [smem:[#allocation16_spill]] %s1525_s5 }
   0x4   :  { %1536 = sst [smem:[#allocation17_spill]] %s1526_s6 }
   0x5   :  { %1537 = sst [smem:[#allocation18_spill]] %s1527_s7 }
   0x6   :  { %13 = vsyncpa [#allocation3], 0 }
   0x7   :  { %15 = vsyncpa [#allocation3 + $0x1], 0 }
   0x8   :  { %16 = vsyncpa [#allocation5], 0  ;;  %s1270_s24 = smov 0   ;;  %s1272_s25 = smov 0  }
   0x9   :  { %s1274_s26 = smov 0   ;;  %s1276_s27 = smov 0  }
   0xa   :  { %s1278_s28 = smov 0   ;;  %s1280_s29 = smov 0  }
   0xb   :  { %s1282_s30 = smov 0   ;;  %s1284_s8 = smov 0  }
   0xc LB: > { %1538 = sst [smem:[#allocation12_spill]] %s1199_s27  ;;  %s898_s9 = sadd.s32 4294967295, %s1215_s8   ;;  %s1215_s8 = sphi %s1284_s8, %s22_s8   ;;  %s1211_s30 = sphi %s1282_s30, %s1567_s30   ;;  %s1207_s29 = sphi %s1280_s29, %s1566_s29   ;;  %s1203_s28 = sphi %s1278_s28, %s1565_s28   ;;  %s1199_s27 = sphi %s1276_s27, %s1564_s27   ;;  %s1195_s26 = sphi %s1274_s26, %s1563_s26   ;;  %s1191_s25 = sphi %s1272_s25, %s1562_s25   ;;  %s1187_s24 = sphi %s1270_s24, %s1561_s24  }
   0xd   : > { %p56_p0 = scmp.ne.s32.totalorder %s1191_s25, %s1187_s24  ;;  %p1310_p1 = scmp.eq.s32.totalorder %s898_s9, 0 }
   0xe   : > { %p1314_p2 = scmp.eq.s32.totalorder %s898_s9, 7  ;;  %p900_p3 = scmp.ge.s32.totalorder %s1215_s8, 1 }
   0xf   : > { %s1539_s10 = scalar_select %p1310_p1, 1, 0 }
  0x10   : > { %s1540_s11 = scalar_select %p1314_p2, 1, 0 }
  0x11   : > { %p235_p4 = scmp.lt.s32.totalorder %s1215_s8, 9  ;;  %p1322_p5 = por %p1310_p1, %p56_p0 }
  0x12   : > { %s1217_s14 = smov [#allocation4]   ;;  %s1218_s17 = smov [#allocation6]  }
  0x13   : > { %s1541_s12 = scalar_select %p1322_p5, 1, 0 }
  0x14   : > { %p1326_p6 = pnand %p900_p3, %p235_p4  ;;  %s251_s15 = sshll.u32 %s1217_s14, 4  ;;  %s252_s15 = int_to_ptr.vmem [resolvable:$true] %s251_s15 }
  0x15   : > { %s261_s18 = sshll.u32 %s1218_s17, 4  ;;  %s1076_s19 = scalar_lea.vmem %s252_s15, 16  ;;  %s262_s18 = int_to_ptr.vmem [resolvable:$true] %s261_s18 }
  0x16   : > { %s1542_s13 = scalar_select %p1326_p6, 1, 0 }
  0x17   : > { %p959_p7 = pneg %p1326_p6  ;;  %p1077_p10 = scmp.ne.s32.totalorder %s252_s15, %s1076_s19 }
  0x18   : > { %s1083_s20 = scalar_lea.vmem %s252_s15, 32  ;;  %p1084_p13 = scmp.lt.s32.totalorder %s252_s15, %s252_s15 }
  0x19   : > { %p1334_p8 = pnand %p959_p7, %p1310_p1  ;;  %p1085_p0 = scmp.lt.s32.totalorder %s1083_s20, %s1076_s19 }
  0x1b   : > { %p1067_p9 = pneg %p1334_p8  ;;  %p1086_p3 = por %p1085_p0, %p1084_p13 }
  0x1d   : > { %p1079_p11 = pnand %p1077_p10, %p1067_p9 }
  0x1f   : > { %p1080_p12 = pneg %p1079_p11 }
  0x21   : > { %p1087_p4 = pnand %p1086_p3, %p1080_p12 }
  0x23   : > { %1090 = shalt.err (!%p1087_p4)
}
  0x24   : > { %s1544_s2 = sld [smem:[#allocation14_spill]]  ;;  %s1102_s23 = scalar_lea.vmem %s262_s18, 1024 }
  0x25   : > { %p1103_p7 = scmp.ne.s32.totalorder %s262_s18, %s1102_s23  ;;  %p1110_p11 = scmp.lt.s32.totalorder %s262_s18, %s262_s18 }
  0x26   : > { %p1111_p5 = scmp.lt.s32.totalorder %s1102_s23, %s1102_s23 }
  0x27   : > { %p1105_p1 = pnand %p1103_p7, %p1067_p9 }
  0x28   : > { %p1112_p6 = por %p1111_p5, %p1110_p11 }
  0x29   : > { %p1106_p10 = pneg %p1105_p1 }
  0x2a   : > { %962 = dma.hbm_to_vmem [thread:$0]  (!%p1334_p8), %s1544_s2, 16, %s252_s15, [#allocation5]  }
  0x2b   : > { %p1113_p2 = pnand %p1112_p6, %p1106_p10 }
  0x2d   : > { %1116 = shalt.err (!%p1113_p2)
}
  0x2e   : > { %s1219_s24 = smov 128   ;;  %s1220_s9 = smov 8  }
  0x2f   : > { %s1545_s3 = sld [smem:[#allocation15_spill]]  ;;  %s31_s17 = sadd.s32 1, %s1207_s29 }
  0x30   : > { %p32_p1 = scmp.ge.s32.totalorder %s31_s17, 4  ;;  %s34_s19 = sadd.s32 1, %s1211_s30 }
  0x31   : > { %s43_s20 = sadd.s32 1, %s1195_s26  ;;  %p50_p2 = scmp.ne.s32.totalorder %s1195_s26, %s1191_s25 }
  0x32   : > { %s1569_s17 = smov (%p32_p1, %s31_s17), 0  ;;  %s1571_s19 = smov (!%p32_p1, %s34_s19), %s1211_s30 }
  0x33   : > { %1546 = sst [smem:[#allocation13_spill]] %s1569_s17  ;;  %s39_s21 = ssub.s32 %s1207_s29, %s1569_s17 }
  0x34   : > { %p51_p5 = scmp.eq.s32.totalorder %s1215_s8, 0  ;;  %p36_p6 = scmp.ge.s32.totalorder %s1571_s19, 2 }
  0x35   : > { %965 = dma.hbm_to_vmem [thread:$0]  (!%p1334_p8), %s1545_s3, 1024, %s262_s18, [#allocation5], %s1219_s24, %s1219_s24, %s1220_s9  }
  0x36   : > { %p1547_p9 = scmp.ne.s32.totalorder %s1540_s11, 0  ;;  %p1373_p8 = por %p51_p5, %p50_p2 }
  0x37   : > { %p972_p13 = scmp.lt.s32.totalorder %s1215_s8, 8  ;;  %s1573_s19 = smov (%p36_p6, %s1571_s19), 0 }
  0x38   : > { %p1369_p12 = por %p1547_p9, %p50_p2  ;;  %s278_s22 = sand.u32 1, %s1195_s26  }
  0x39   : > { %s905_s23 = sshll.u32 %s1211_s30, 2  ;;  %s38_s24 = ssub.s32 %s1211_s30, %s1573_s19 }
  0x3a   : > { %s40_s9 = sor.u32 %s39_s21, %s38_s24  ;;  %s904_s14 = sshll.u32 %s278_s22, 3 }
  0x3b   : > { %p41_p0 = scmp.eq.s32.totalorder %s40_s9, 0  ;;  %s287_s11 = sadd.s32 %s1207_s29, %s905_s23 }
  0x3c   : > { %s282_s15 = scalar_lea.vmem [#allocation2], %s904_s14  ;;  %s906_s17 = sshll.u32 %s287_s11, 7 }
  0x3d   : > { %s291_s2 = sshll.u32 %s282_s15, 4  ;;  %s289_s5 = scalar_lea.hbm %s1520_s0, %s906_s17  ;;  %s292_s2 = int_to_ptr.vmem [resolvable:$true] %s291_s2 }
  0x3e   : > { %s1386_s3 = scalar_select %p41_p0, %s1195_s26, %s43_s20  }
  0x3f   : > { %p1395_p3 = pnand %p972_p13, %p1373_p8  ;;  %s279_s21 = scalar_lea.sflag [#allocation3], %s278_s22 }
  0x40   : > { %s1130_s23 = scalar_lea.vmem %s292_s2, 128  ;;  %s1221_s20 = smov [#allocation2]  }
  0x41   : > { %p1119_p4 = pneg %p1395_p3  ;;  %p1131_p7 = scmp.ne.s32.totalorder %s292_s2, %s1130_s23 }
  0x42   : > { %s1135_s24 = sshll.u32 %s1221_s20, 4  ;;  %s1136_s24 = int_to_ptr.vmem [resolvable:$false] %s1135_s24 }
  0x43   : > { %p1133_p10 = pnand %p1131_p7, %p1119_p4  ;;  %s1137_s9 = scalar_lea.vmem %s1136_s24, 256 }
  0x44   : > { %p1138_p1 = scmp.lt.s32.totalorder %s292_s2, %s1136_s24  ;;  %p1139_p2 = scmp.lt.s32.totalorder %s1137_s9, %s1130_s23 }
  0x45   : > { %p1134_p11 = pneg %p1133_p10 }
  0x46   : > { %p1140_p5 = por %p1139_p2, %p1138_p1 }
  0x48   : > { %p1141_p6 = pnand %p1140_p5, %p1134_p11 }
  0x4a   : > { %1144 = shalt.err (!%p1141_p6)
}
  0x4b   : > { %969 = dma.hbm_to_vmem [thread:$0]  (!%p1395_p3), %s289_s5, 128, %s292_s2, %s279_s21  }
  0x4c   : > { %p1551_p9 = scmp.ne.s32.totalorder %s1542_s13, 0 }
  0x4d   : > { %s1406_s6 = sand.u32 (!%p1551_p9), 1, %s1191_s25   ;;  %p1552_p8 = scmp.ne.s32.totalorder (!%p1551_p9), %s1541_s12, 0 }
  0x4e   : > { %300 = sbr.rel (%p1551_p9) target bundleno = 761 (0x2f9), region = 40  ;;  %s908_s7 = sshll.u32 (!%p1551_p9), %s1406_s6, 3 }
  0x4f   : > { %s303_s17 = scalar_lea.sflag (!%p1551_p9), [#allocation3], %s1406_s6  ;;  %s306_s18 = scalar_lea.vmem (!%p1551_p9), [#allocation2], %s908_s7 }
  0x53   : > { %1178 = dma.done.wait (%p1552_p8), %s303_s17, 128  }
  0x54   : > { %1180 = vsyncadd (%p1552_p8), %s303_s17, 4294967168  ;;  %p1553_p13 = scmp.ne.s32.totalorder %s1539_s10, 0 }
  0x56   : > { %1182 = dma.done.wait (%p1553_p13), [#allocation5], 1040  }
  0x57   : > { %1184 = vsyncadd (%p1553_p13), [#allocation5], 4294966256  ;;  %vm354_vm0 = vcmask 523264   ;;  %v353_v0 = vld [vmem:[%s306_s18] sm:$0xff]  ;;  %v1056_v10 = vld [vmem:[#allocation6 + $0x20] ss:$8 sps:$4 sm:$0xff]   ;;  %v396_v26 = vlaneseq }
  0x58   : > { %v355_v1 = vsel %vm354_vm0, %v353_v0, 0.0  ;;  %v1051_v7 = vld [vmem:[#allocation6 + $0x34] ss:$8 sps:$4 sm:$0xff]   ;;  %v1053_v8 = vld [vmem:[#allocation6 + $0x30] ss:$8 sps:$4 sm:$0xff]   ;;  %v1222_v11 = vmov 0  }
  0x59   : > { %356 = vadd.xlane.f32.xlu0 %v355_v1  ;;  %v1054_v9 = vld [vmem:[#allocation6 + $0x24] ss:$8 sps:$4 sm:$0xff]   ;;  %457 = vmatprep.subr.bf16.mxu0 %v1051_v7  ;;  %v1057_v12 = vld [vmem:[#allocation6 + $0x14] ss:$8 sps:$4 sm:$0xff]   ;;  %v1059_v13 = vld [vmem:[#allocation6 + $0x10] ss:$8 sps:$4 sm:$0xff]  }
  0x5a   : > { %458 = vmatpush1.bf16.msra.mxu0 %v1053_v8  ;;  %481 = vmatprep.mubr.bf16.mxu0 %v1222_v11  ;;  %v1060_v14 = vld [vmem:[#allocation6 + $0x4] ss:$8 sps:$4 sm:$0xff]   ;;  %v1062_v15 = vld [vmem:[#allocation6] ss:$8 sps:$4 sm:$0xff]   ;;  %v915_v22 = vld [vmem:[#allocation4] ss:$0 sm:$0xff] }
  0x5b   : > { %459 = vmatprep.subr.bf16.mxu0 %v1054_v9  ;;  %v914_v20 = vld [vmem:[%s1521_s1] ss:$0 sm:$0xff]  ;;  %v397_v27 = vshrl.u32 %v396_v26, 7  ;;  %s1428_s12 = sshll.u32 %s1406_s6, 4  ;;  %vm491_vm1 = vcmask 125952   ;;  %s1223_s13 = smov 48  }
  0x5c   : > { %v394_v29 = vld [vmem:[%s1524_s4] sm:$0x3]  ;;  %s1224_s22 = smov 64   ;;  %s1431_s14 = scalar_lea.vmem [#allocation7], %s1428_s12 }
  0x5d   : > { %v398_v28 = vsub.s32 0, %v397_v27  ;;  %v402_v30 = vsub.s32 1, %v397_v27  ;;  %s1436_s11 = scalar_lea.vmem [#allocation9], %s1428_s12  ;;  %s1225_s15 = smov 80  }
  0x5e   : > { %460 = vmatpush1.bf16.msra.mxu0 %v1056_v10  ;;  %s1226_s21 = smov 112   ;;  %s1227_s23 = smov 96  }
  0x5f   : > { %461 = vmatprep.subr.bf16.mxu0 %v1057_v12  ;;  %v399_v31 = vrot.slane %v394_v29, %v398_v28  ;;  %v403_v32 = vrot.slane %v394_v29, %v402_v30  ;;  %s1228_s20 = smov 32   ;;  %s1229_s24 = smov 16  }
  0x60   : > { %s1441_s9 = scalar_lea.vmem [#allocation8], %s1428_s12  ;;  %s1554_s6 = sld [smem:[#allocation12_spill]] (%p1369_p12) }
  0x61   : > { %s939_s7 = sshll.u32 (%p1369_p12), %s1203_s28, 4  ;;  %s1555_s27 = sld [smem:[#allocation16_spill]] (%p1369_p12) }
  0x62   : > { %462 = vmatpush1.bf16.msra.mxu0 %v1059_v13 }
  0x63   : > { %463 = vmatprep.subr.bf16.mxu0 %v1060_v14 }
  0x66   : > { %464 = vmatpush1.bf16.msra.mxu0 %v1062_v15  ;;  %s566_s17 = sadd.s32 (%p1369_p12), %s1554_s6, %s939_s7 }
  0x67   : > { %s940_s18 = sshll.u32 (%p1369_p12), %s566_s17, 2 }
  0x68   : > { %s568_s10 = scalar_lea.vmem (%p1369_p12), %s1555_s27, %s940_s18 }
  0xe2   : > { %v357_v2 = vpop.xlane.xlu0 %356 }
  0xe3   : > { %v359_v3 = vmul.f32 0.015625, %v357_v2 }
  0xe5   : > { %v360_v4 = vsub.f32 %v353_v0, %v359_v3 }
  0xe7   : > { %v361_v5 = vmul.f32 %v360_v4, %v360_v4 }
  0xe9   : > { %v362_v6 = vsel %vm354_vm0, %v361_v5, 0.0 }
  0xea   : > { %363 = vadd.xlane.f32.xlu0 %v362_v6 }
 0x173   : > { %v364_v16 = vpop.xlane.xlu0 %363 }
 0x174   : > { %v365_v17 = vmul.f32 0.015625, %v364_v16 }
 0x176   : > { %v366_v18 = vadd.f32 1e-05, %v365_v17 }
 0x178   : > { %1063 = vrsqrt.f32 %v366_v18 }
 0x185   : > { %v1064_v19 = vpop.eup %1063 }
 0x186   : > { %v368_v21 = vmul.f32 %v1064_v19, %v360_v4 }
 0x188   : > { %v376_v23 = vmul.f32 %v914_v20, %v368_v21 }
 0x18a   : > { %v384_v24 = vadd.f32 %v915_v22, %v376_v23 }
 0x18c   : > { %v385_v25 = vpack.c.bf16 %v384_v24, %v384_v24 }
 0x18e   : > { %924 = vmatmul.mubr.msk.bf16.vlgmr.msra.gmra.mxu0 %vm354_vm0, %v385_v25 }
 0x24e   : > { %v483_v33 = vpop.f32.mrf.mxu0 }
 0x24f   : > { %v484_v34 = vadd.f32 %v483_v33, %v399_v31 }
 0x250   : > { %v485_v35 = vpop.f32.mrf.mxu0 }
 0x251   : > { %v490_v36 = vpack.c.bf16 %v484_v34, %v484_v34  ;;  %v486_v37 = vadd.f32 %v485_v35, %v403_v32 }
 0x252   : > { %v487_v38 = vpop.f32.mrf.mxu0 }
 0x253   : > { %v500_v39 = vpack.c.bf16 %v486_v37, %v486_v37  ;;  %507 = vrot.lane.b32.xlu0 %v490_v36, %s1223_s13  ;;  %496 = vrot.lane.b32.xlu1 %v490_v36, %s1224_s22  ;;  %492 = vst.msk [vmem:[%s1431_s14] sm:$0xf] %vm491_vm1, %v490_v36 }
 0x254   : > { %v488_v40 = vpop.f32.mrf.mxu0 }
 0x255   : > { %501 = vst.msk [vmem:[%s1436_s11] sm:$0xf] %vm491_vm1, %v500_v39 }
 0x257   : > { %545 = vrot.lane.b32.xlu0 %v500_v39, %s1225_s15  ;;  %502 = vrot.lane.b32.xlu1 %v490_v36, %s1226_s21 }
 0x25a   : > { %v585_v51 = vld [vmem:[%s1431_s14] sm:$0xf] (%p1369_p12) }
 0x25b   : > { %520 = vrot.lane.b32.xlu1 %v490_v36, %s1227_s23  ;;  %586 = vst [vmem:[%s568_s10] sm:$0xf] (%p1369_p12), %v585_v51 }
 0x25f   : > { %525 = vrot.lane.b32.xlu1 %v490_v36, %s1228_s20 }
 0x263   : > { %535 = vrot.lane.b32.xlu1 %v490_v36, %s1225_s15 }
 0x267   : > { %515 = vrot.lane.b32.xlu1 %v500_v39, %s1226_s21 }
 0x26b   : > { %530 = vrot.lane.b32.xlu1 %v500_v39, %s1227_s23 }
 0x26f   : > { %540 = vrot.lane.b32.xlu1 %v490_v36, %s1229_s24 }
 0x2c5   : > { %v508_v41 = vpop.permute.xlu0 %507  ;;  %v497_v42 = vpop.permute.xlu1 %496 }
 0x2c6   : > { %927 = vst.msk [vmem:[%s1441_s9 + $0x4] sm:$0xf] %vm491_vm1, %v508_v41  ;;  %499 = vst.msk [vmem:[%s1441_s9] sm:$0xf] %vm491_vm1, %v497_v42 }
 0x2c9   : > { %v546_v43 = vpop.permute.xlu0 %545  ;;  %v503_v44 = vpop.permute.xlu1 %502 }
 0x2ca   : > { %935 = vst.msk [vmem:[%s1436_s11 + $0xc] sm:$0xf] %vm491_vm1, %v546_v43  ;;  %926 = vst.msk [vmem:[%s1431_s14 + $0x4] sm:$0xf] %vm491_vm1, %v503_v44 }
 0x2cd   : > { %v521_v45 = vpop.permute.xlu1 %520 }
 0x2ce   : > { %930 = vst.msk [vmem:[%s1431_s14 + $0x8] sm:$0xf] %vm491_vm1, %v521_v45 }
 0x2d1   : > { %v526_v46 = vpop.permute.xlu1 %525  ;;  %v587_v52 = vld [vmem:[%s1431_s14 + $0x4] sm:$0xf] (%p1369_p12) }
 0x2d2   : > { %931 = vst.msk [vmem:[%s1441_s9 + $0x8] sm:$0xf] %vm491_vm1, %v526_v46  ;;  %588 = vst [vmem:[%s568_s10 + $0x10] sm:$0xf] (%p1369_p12), %v587_v52 }
 0x2d5   : > { %v536_v47 = vpop.permute.xlu1 %535  ;;  %v589_v53 = vld [vmem:[%s1431_s14 + $0x8] sm:$0xf] (%p1369_p12) }
 0x2d6   : > { %933 = vst.msk [vmem:[%s1431_s14 + $0xc] sm:$0xf] %vm491_vm1, %v536_v47  ;;  %590 = vst [vmem:[%s568_s10 + $0x20] sm:$0xf] (%p1369_p12), %v589_v53 }
 0x2d9   : > { %v516_v48 = vpop.permute.xlu1 %515 }
 0x2da   : > { %929 = vst.msk [vmem:[%s1436_s11 + $0x4] sm:$0xf] %vm491_vm1, %v516_v48 }
 0x2dd   : > { %v531_v49 = vpop.permute.xlu1 %530  ;;  %v591_v54 = vld [vmem:[%s1431_s14 + $0xc] sm:$0xf] (%p1369_p12) }
 0x2de   : > { %932 = vst.msk [vmem:[%s1436_s11 + $0x8] sm:$0xf] %vm491_vm1, %v531_v49  ;;  %564 = sbr.rel (!%p1369_p12) target bundleno = 739 (0x2e3), region = 56  ;;  %592 = vst [vmem:[%s568_s10 + $0x30] sm:$0xf] (%p1369_p12), %v591_v54 }
 0x2e1   : > { %v541_v50 = vpop.permute.xlu1 %540 }
 0x2e2   : > { %934 = vst.msk [vmem:[%s1441_s9 + $0xc] sm:$0xf] %vm491_vm1, %v541_v50 }
 0x2e3 PF: > { %624 = sbr.rel (!%p1369_p12) target bundleno = 750 (0x2ee), region = 97  ;;  %s1556_s12 = sld [smem:[#allocation12_spill]] (%p1369_p12)  ;;  %v645_v55 = vld [vmem:[%s1441_s9] sm:$0xf] (%p1369_p12)  ;;  %v647_v56 = vld [vmem:[%s1441_s9 + $0x4] sm:$0xf] (%p1369_p12) }
 0x2e4   : > { %s941_s13 = sshll.u32 (%p1369_p12), %s1203_s28, 4  ;;  %v649_v57 = vld [vmem:[%s1441_s9 + $0x8] sm:$0xf] (%p1369_p12)  ;;  %s1557_s23 = sld [smem:[#allocation17_spill]] (%p1369_p12) }
 0x2e9   : > { %s626_s22 = sadd.s32 %s1556_s12, %s941_s13  ;;  %v651_v58 = vld [vmem:[%s1441_s9 + $0xc] sm:$0xf] }
 0x2ea   : > { %s942_s14 = sshll.u32 %s626_s22, 2 }
 0x2eb   : > { %s628_s20 = scalar_lea.vmem %s1557_s23, %s942_s14 }
 0x2ec   : > { %646 = vst [vmem:[%s628_s20] sm:$0xf] %v645_v55  ;;  %648 = vst [vmem:[%s628_s20 + $0x10] sm:$0xf] %v647_v56 }
 0x2ed   : > { %650 = vst [vmem:[%s628_s20 + $0x20] sm:$0xf] %v649_v57  ;;  %652 = vst [vmem:[%s628_s20 + $0x30] sm:$0xf] %v651_v58 }
 0x2ee PF: > { %684 = sbr.rel (!%p1369_p12) target bundleno = 761 (0x2f9), region = 138  ;;  %s1558_s24 = sld [smem:[#allocation12_spill]] (%p1369_p12)  ;;  %v705_v59 = vld [vmem:[%s1436_s11] sm:$0xf] (%p1369_p12)  ;;  %v707_v60 = vld [vmem:[%s1436_s11 + $0x4] sm:$0xf] (%p1369_p12) }
 0x2ef   : > { %s943_s9 = sshll.u32 (%p1369_p12), %s1203_s28, 4  ;;  %v709_v61 = vld [vmem:[%s1436_s11 + $0x8] sm:$0xf] (%p1369_p12)  ;;  %v711_v62 = vld [vmem:[%s1436_s11 + $0xc] sm:$0xf] (%p1369_p12)  ;;  %s1559_s2 = sld [smem:[#allocation18_spill]] (%p1369_p12) }
 0x2f4   : > { %s686_s6 = sadd.s32 %s1558_s24, %s943_s9 }
 0x2f5   : > { %s944_s7 = sshll.u32 %s686_s6, 2 }
 0x2f6   : > { %s688_s5 = scalar_lea.vmem %s1559_s2, %s944_s7 }
 0x2f7   : > { %706 = vst [vmem:[%s688_s5] sm:$0xf] %v705_v59  ;;  %708 = vst [vmem:[%s688_s5 + $0x10] sm:$0xf] %v707_v60 }
 0x2f8   : > { %710 = vst [vmem:[%s688_s5 + $0x20] sm:$0xf] %v709_v61  ;;  %712 = vst [vmem:[%s688_s5 + $0x30] sm:$0xf] %v711_v62 }
 0x2f9 PF: > { %s22_s8 = sadd.s32 1, %s1215_s8   ;;  %s1560_s16 = sld [smem:[#allocation13_spill]] }
 0x2fa   : > { %p19_p12 = scmp.ge.s32.totalorder %s22_s8, 10   ;;  %s1561_s24 = smov %s1191_s25 }
 0x2fb   : > { %s1562_s25 = smov %s1195_s26  ;;  %s1563_s26 = smov %s1386_s3 }
 0x2fc   : > { %s1564_s27 = smov %s1207_s29  ;;  %s1565_s28 = smov %s1211_s30 }
 0x2fd   : > { %s1567_s30 = smov %s1573_s19  ;;  %21 = sbr.rel (!%p19_p12) target bundleno = 12 (0xc), region = 244 }
 0x2ff   : > { %s1566_s29 = smov %s1560_s16 }
 0x302   :  { %768 = vsyncpa [#allocation3], 1 }
 0x303   :  { %770 = vsyncpa [#allocation3 + $0x1], 1 }
 0x304   :  { %771 = vsyncpa [#allocation5], 1 }

</bundles_post_ra>
